<compile_context>
chip_gen: v6e
topology: v6e:2x2x1
jax: 0.10.0
libtpu: 0.0.40
codegen_flags: <defaults>
</compile_context>

<pallas_src>
import functools

import jax
import jax.numpy as jnp
from jax.experimental import pallas as pl
from jax.experimental.pallas import tpu as pltpu

SHAPE_CODE_SIZE = 512   # module default
HIDDEN = 1024           # nn.Linear(shape_code_size, 1024)
EMBED_DIM = 256         # cad_net.embedding_dim (ResNetEncoder not given; fixed here)
MARGIN = 0.5            # module default


# ----------------------------------------------------------------------------
# Kernels
# ----------------------------------------------------------------------------
def _image_mlp(shape_code_bf16, w1_ref, b1_ref, w2_ref, b2_ref):
    """Linear(512->1024) + ReLU + Linear(1024->E) + ReLU, bf16 MXU / f32 accum."""
    h = jnp.dot(shape_code_bf16, w1_ref[...], preferred_element_type=jnp.float32)
    h = jnp.maximum(h + b1_ref[...], 0.0)
    e = jnp.dot(h.astype(jnp.bfloat16), w2_ref[...],
                preferred_element_type=jnp.float32)
    return jnp.maximum(e + b2_ref[...], 0.0)


def _retrieval_loss_kernel(shape_code_ref, w1_ref, b1_ref, w2_ref, b2_ref,
                           noc_resnet_ref, pos_ref, neg_ref,
                           out_ref, loss_ref, *, margin):
    # image MLP + residual add with the resnet noc embedding
    e = _image_mlp(shape_code_ref[...], w1_ref, b1_ref, w2_ref, b2_ref)
    noc = noc_resnet_ref[...] + e
    out_ref[...] = noc

    # TripletMarginLoss (p=2, eps=1e-6 added to the difference, mean reduce)
    eps = 1e-6
    dp = noc - pos_ref[...] + eps
    dn = noc - neg_ref[...] + eps
    d_pos = jnp.sqrt(jnp.sum(dp * dp, axis=-1, keepdims=True))
    d_neg = jnp.sqrt(jnp.sum(dn * dn, axis=-1, keepdims=True))
    per_row = jnp.maximum(d_pos - d_neg + margin, 0.0)
    loss_ref[0, 0] = jnp.sum(per_row) * (1.0 / per_row.shape[0])


def _embed_kernel(shape_code_ref, w1_ref, b1_ref, w2_ref, b2_ref,
                  noc_resnet_ref, out_ref):
    e = _image_mlp(shape_code_ref[...], w1_ref, b1_ref, w2_ref, b2_ref)
    out_ref[...] = noc_resnet_ref[...] + e


# ----------------------------------------------------------------------------
# Wrappers
# ----------------------------------------------------------------------------
_VMEM = pl.BlockSpec(memory_space=pltpu.MemorySpace.VMEM)
_SMEM = pl.BlockSpec(memory_space=pltpu.MemorySpace.SMEM)


def _mlp_cost(n, d_in, hidden, e_dim, w1, w2, extra_flops=0, extra_bytes=0,
              transcendentals=0):
    flops = 2 * n * (d_in * hidden + hidden * e_dim) + extra_flops
    bytes_accessed = (w1.size * w1.dtype.itemsize + w2.size * w2.dtype.itemsize
                      + (hidden + e_dim) * 4          # biases
                      + n * d_in * 2                  # bf16 shape_code
                      + 2 * n * e_dim * 4             # noc_resnet in + noc out
                      + extra_bytes)
    return pl.CostEstimate(flops=flops, transcendentals=transcendentals,
                           bytes_accessed=bytes_accessed)


def retrieval_loss_fused(shape_code, w1, b1, w2, b2,
                         noc_resnet_embed, pos_cad_embed, neg_cad_embed,
                         *, margin=MARGIN):
    n, d_in = shape_code.shape
    hidden = w1.shape[1]
    e_dim = noc_resnet_embed.shape[1]

    kern = functools.partial(_retrieval_loss_kernel, margin=float(margin))
    cost = _mlp_cost(n, d_in, hidden, e_dim, w1, w2,
                     extra_flops=12 * n * e_dim,
                     extra_bytes=2 * n * e_dim * 4 + 4,
                     transcendentals=2 * n)

    noc, loss = pl.pallas_call(
        kern,
        out_shape=(jax.ShapeDtypeStruct((n, e_dim), jnp.float32),
                   jax.ShapeDtypeStruct((1, 1), jnp.float32)),
        in_specs=[_VMEM] * 8,
        out_specs=(_VMEM, _SMEM),
        cost_estimate=cost,
    )(shape_code.astype(jnp.bfloat16), w1, b1, w2, b2,
      noc_resnet_embed, pos_cad_embed, neg_cad_embed)
    return noc, loss[0, 0]


def embed_fused(shape_code, w1, b1, w2, b2, noc_resnet_embed):
    n, d_in = shape_code.shape
    hidden = w1.shape[1]
    e_dim = noc_resnet_embed.shape[1]

    cost = _mlp_cost(n, d_in, hidden, e_dim, w1, w2)

    return pl.pallas_call(
        _embed_kernel,
        out_shape=jax.ShapeDtypeStruct((n, e_dim), jnp.float32),
        in_specs=[_VMEM] * 6,
        out_specs=_VMEM,
        cost_estimate=cost,
    )(shape_code.astype(jnp.bfloat16), w1, b1, w2, b2, noc_resnet_embed)


# ----------------------------------------------------------------------------
# RetrievalHead wrapper (parameters initialized deterministically in-script)
# ----------------------------------------------------------------------------
class RetrievalHeadPallas:
    def __init__(self, shape_code_size=SHAPE_CODE_SIZE, margin=MARGIN,
                 embedding_dim=EMBED_DIM, key=None):
        if key is None:
            key = jax.random.PRNGKey(42)
        self.margin = margin
        k1, k2, k3, k4 = jax.random.split(key, 4)
        s1 = 1.0 / jnp.sqrt(jnp.float32(shape_code_size))
        s2 = 1.0 / jnp.sqrt(jnp.float32(HIDDEN))
        # image MLP params (noc_net['image']); weights stored bf16 for HBM BW,
        # biases kept f32 (post-accumulation math is f32).
        self.w1 = jax.random.uniform(k1, (shape_code_size, HIDDEN),
                                     jnp.float32, -s1, s1).astype(jnp.bfloat16)
        self.b1 = jax.random.uniform(k2, (1, HIDDEN), jnp.float32, -s1, s1)
        self.w2 = jax.random.uniform(k3, (HIDDEN, embedding_dim),
                                     jnp.float32, -s2, s2).astype(jnp.bfloat16)
        self.b2 = jax.random.uniform(k4, (1, embedding_dim), jnp.float32, -s2, s2)

    def embed_nocs(self, shape_code, noc_resnet_embed):
        # embedding-only path: dedicated kernel, no pos/neg DMA, no loss math
        return embed_fused(shape_code, self.w1, self.b1, self.w2, self.b2,
                           noc_resnet_embed)

    def retrieval_loss(self, shape_code, noc_resnet_embed,
                       pos_cad_embed, neg_cad_embed):
        noc, loss = retrieval_loss_fused(shape_code, self.w1, self.b1,
                                         self.w2, self.b2, noc_resnet_embed,
                                         pos_cad_embed, neg_cad_embed,
                                         margin=self.margin)
        return {"noc_embed": noc, "loss_triplet": loss}


# ----------------------------------------------------------------------------
def _reference(head, shape_code, noc_resnet_embed, pos_e, neg_e):
    # pure-JAX reference (same bf16-weight / f32-accumulate numerics)
    xb = shape_code.astype(jnp.bfloat16)
    h = jnp.maximum(jnp.dot(xb, head.w1, preferred_element_type=jnp.float32)
                    + head.b1, 0.0)
    e = jnp.maximum(jnp.dot(h.astype(jnp.bfloat16), head.w2,
                            preferred_element_type=jnp.float32) + head.b2, 0.0)
    noc = noc_resnet_embed + e
    eps = 1e-6
    dp = jnp.sqrt(jnp.sum((noc - pos_e + eps) ** 2, axis=-1))
    dn = jnp.sqrt(jnp.sum((noc - neg_e + eps) ** 2, axis=-1))
    loss = jnp.mean(jnp.maximum(dp - dn + head.margin, 0.0))
    return noc, loss


if __name__ == "__main__":
    key = jax.random.PRNGKey(0)
    kc, kn, kp, kg = jax.random.split(key, 4)

    N = 32  # module samples up to 32 retrieval instances per training step
    shape_code = jax.random.normal(kc, (N, SHAPE_CODE_SIZE), jnp.float32)
    noc_resnet_embed = jax.random.normal(kn, (N, EMBED_DIM), jnp.float32)
    pos_cad_embed = jax.random.normal(kp, (N, EMBED_DIM), jnp.float32)
    neg_cad_embed = jax.random.normal(kg, (N, EMBED_DIM), jnp.float32)

    head = RetrievalHeadPallas()

    # training path: fused MLP + residual + triplet loss
    out = head.retrieval_loss(shape_code, noc_resnet_embed,
                              pos_cad_embed, neg_cad_embed)
    jax.block_until_ready(out["noc_embed"])
    jax.block_until_ready(out["loss_triplet"])

    # embedding-only path
    emb = head.embed_nocs(shape_code, noc_resnet_embed)
    jax.block_until_ready(emb)

    # silent numerical sanity checks against pure-JAX reference
    ref_noc, ref_loss = _reference(head, shape_code, noc_resnet_embed,
                                   pos_cad_embed, neg_cad_embed)
    assert jnp.allclose(out["noc_embed"], ref_noc, atol=2e-3, rtol=2e-3)
    assert jnp.allclose(out["loss_triplet"], ref_loss, atol=2e-3, rtol=2e-3)
    assert jnp.allclose(emb, ref_noc, atol=2e-3, rtol=2e-3)

    print("KERNEL_OK")
</pallas_src>

<mosaic_0001>
module attributes {stable_mosaic.version = 11 : i64} {
  func.func @_retrieval_loss_kernel(%arg0: memref<32x512xbf16, #tpu.memory_space<vmem>>, %arg1: memref<512x1024xbf16, #tpu.memory_space<vmem>>, %arg2: memref<1x1024xf32, #tpu.memory_space<vmem>>, %arg3: memref<1024x256xbf16, #tpu.memory_space<vmem>>, %arg4: memref<1x256xf32, #tpu.memory_space<vmem>>, %arg5: memref<32x256xf32, #tpu.memory_space<vmem>>, %arg6: memref<32x256xf32, #tpu.memory_space<vmem>>, %arg7: memref<32x256xf32, #tpu.memory_space<vmem>>, %arg8: memref<32x256xf32, #tpu.memory_space<vmem>>, %arg9: memref<1x1xf32, #tpu.memory_space<smem>>) attributes {dimension_semantics = [], scalar_prefetch = 0 : i64, scratch_operands = 0 : i64, tpu.core_type = #tpu.core_type<tc>} {
    %c0 = arith.constant 0 : index
    %c0_0 = arith.constant 0 : index
    %0 = vector.load %arg0[%c0, %c0_0] : memref<32x512xbf16, #tpu.memory_space<vmem>>, vector<32x512xbf16>
    %c0_1 = arith.constant 0 : index
    %c0_2 = arith.constant 0 : index
    %1 = vector.load %arg1[%c0_1, %c0_2] : memref<512x1024xbf16, #tpu.memory_space<vmem>>, vector<512x1024xbf16>
    %cst = arith.constant dense<0.000000e+00> : vector<32x1024xf32>
    %2 = tpu.matmul %0, %1, %cst {dimension_numbers = #tpu.dot_dimension_numbers<[1], [0], [0], [1], [0, 0, 1, 1], [], []>} : vector<32x512xbf16>, vector<512x1024xbf16>, vector<32x1024xf32> -> vector<32x1024xf32>
    %c0_3 = arith.constant 0 : index
    %c0_4 = arith.constant 0 : index
    %3 = vector.load %arg2[%c0_3, %c0_4] : memref<1x1024xf32, #tpu.memory_space<vmem>>, vector<1x1024xf32>
    %4 = vector.broadcast %3 : vector<1x1024xf32> to vector<32x1024xf32>
    %5 = arith.addf %2, %4 : vector<32x1024xf32>
    %cst_5 = arith.constant 0.000000e+00 : f32
    %6 = vector.broadcast %cst_5 : f32 to vector<32x1024xf32>
    %7 = arith.maximumf %5, %6 : vector<32x1024xf32>
    %8 = arith.truncf %7 : vector<32x1024xf32> to vector<32x1024xbf16>
    %c0_6 = arith.constant 0 : index
    %c0_7 = arith.constant 0 : index
    %9 = vector.load %arg3[%c0_6, %c0_7] : memref<1024x256xbf16, #tpu.memory_space<vmem>>, vector<1024x256xbf16>
    %cst_8 = arith.constant dense<0.000000e+00> : vector<32x256xf32>
    %10 = tpu.matmul %8, %9, %cst_8 {dimension_numbers = #tpu.dot_dimension_numbers<[1], [0], [0], [1], [0, 0, 1, 1], [], []>} : vector<32x1024xbf16>, vector<1024x256xbf16>, vector<32x256xf32> -> vector<32x256xf32>
    %c0_9 = arith.constant 0 : index
    %c0_10 = arith.constant 0 : index
    %11 = vector.load %arg4[%c0_9, %c0_10] : memref<1x256xf32, #tpu.memory_space<vmem>>, vector<1x256xf32>
    %12 = vector.broadcast %11 : vector<1x256xf32> to vector<32x256xf32>
    %13 = arith.addf %10, %12 : vector<32x256xf32>
    %cst_11 = arith.constant 0.000000e+00 : f32
    %14 = vector.broadcast %cst_11 : f32 to vector<32x256xf32>
    %15 = arith.maximumf %13, %14 : vector<32x256xf32>
    %c0_12 = arith.constant 0 : index
    %c0_13 = arith.constant 0 : index
    %16 = vector.load %arg5[%c0_12, %c0_13] : memref<32x256xf32, #tpu.memory_space<vmem>>, vector<32x256xf32>
    %17 = arith.addf %16, %15 : vector<32x256xf32>
    %c0_14 = arith.constant 0 : index
    %c0_15 = arith.constant 0 : index
    %18 = vector.load %arg8[%c0_14, %c0_15] : memref<32x256xf32, #tpu.memory_space<vmem>>, vector<32x256xf32>
    tpu.vector_store %arg8[%c0_14, %c0_15], %17 {strides = array<i32>} : memref<32x256xf32, #tpu.memory_space<vmem>>, vector<32x256xf32>,
    %c0_16 = arith.constant 0 : index
    %c0_17 = arith.constant 0 : index
    %19 = vector.load %arg6[%c0_16, %c0_17] : memref<32x256xf32, #tpu.memory_space<vmem>>, vector<32x256xf32>
    %20 = arith.subf %17, %19 : vector<32x256xf32>
    %cst_18 = arith.constant 9.99999997E-7 : f32
    %21 = vector.broadcast %cst_18 : f32 to vector<32x256xf32>
    %22 = arith.addf %20, %21 : vector<32x256xf32>
    %c0_19 = arith.constant 0 : index
    %c0_20 = arith.constant 0 : index
    %23 = vector.load %arg7[%c0_19, %c0_20] : memref<32x256xf32, #tpu.memory_space<vmem>>, vector<32x256xf32>
    %24 = arith.subf %17, %23 : vector<32x256xf32>
    %cst_21 = arith.constant 9.99999997E-7 : f32
    %25 = vector.broadcast %cst_21 : f32 to vector<32x256xf32>
    %26 = arith.addf %24, %25 : vector<32x256xf32>
    %27 = arith.mulf %22, %22 : vector<32x256xf32>
    %cst_22 = arith.constant dense<0.000000e+00> : vector<32xf32>
    %28 = vector.multi_reduction <add>, %27, %cst_22 [1] : vector<32x256xf32> to vector<32xf32>
    %29 = vector.shape_cast %28 : vector<32xf32> to vector<32x1xf32>
    %30 = math.sqrt %29 : vector<32x1xf32>
    %31 = arith.mulf %26, %26 : vector<32x256xf32>
    %cst_23 = arith.constant dense<0.000000e+00> : vector<32xf32>
    %32 = vector.multi_reduction <add>, %31, %cst_23 [1] : vector<32x256xf32> to vector<32xf32>
    %33 = vector.shape_cast %32 : vector<32xf32> to vector<32x1xf32>
    %34 = math.sqrt %33 : vector<32x1xf32>
    %35 = arith.subf %30, %34 : vector<32x1xf32>
    %cst_24 = arith.constant 5.000000e-01 : f32
    %36 = vector.broadcast %cst_24 : f32 to vector<32x1xf32>
    %37 = arith.addf %35, %36 : vector<32x1xf32>
    %cst_25 = arith.constant 0.000000e+00 : f32
    %38 = vector.broadcast %cst_25 : f32 to vector<32x1xf32>
    %39 = arith.maximumf %37, %38 : vector<32x1xf32>
    %40 = vector.shape_cast %39 : vector<32x1xf32> to vector<1x32x1xf32>
    %cst_26 = arith.constant dense<0.000000e+00> : vector<1xf32>
    %41 = vector.multi_reduction <add>, %40, %cst_26 [1, 2] : vector<1x32x1xf32> to vector<1xf32>
    %42 = vector.shape_cast %41 : vector<1xf32> to vector<1x1x1xf32>
    %43 = vector.extract %42[0, 0, 0] : f32 from vector<1x1x1xf32>
    %cst_27 = arith.constant 3.125000e-02 : f32
    %44 = arith.mulf %43, %cst_27 : f32
    %c0_28 = arith.constant 0 : index
    %c0_29 = arith.constant 0 : index
    %45 = memref.load %arg9[%c0_28, %c0_29] : memref<1x1xf32, #tpu.memory_space<smem>>
    memref.store %44, %arg9[%c0_28, %c0_29] : memref<1x1xf32, #tpu.memory_space<smem>>
    return
  }
}

</mosaic_0001>

<bundles_post_ra>
// kernel: tpu_custom_call.1
= control target key start
LH: loop header
LB: loop body
LE: loop exit
PB: predicated region body
PF: predicated region fallthrough
CT: control target
= control target key end

     0   :  { %15 = vsyncpa [#allocation3], 0  ;;  %s4516_s0 = inlined_call_operand.hbm [shape: bf16[32,512], index: 0, kind: input, shape index: {}]   ;;  %s4517_s1 = inlined_call_operand.hbm [shape: bf16[512,1024], index: 1, kind: input, shape index: {}]   ;;  %s4518_s2 = inlined_call_operand.hbm [shape: f32[1,1024], index: 2, kind: input, shape index: {}]   ;;  %s4519_s3 = inlined_call_operand.hbm [shape: bf16[1024,256], index: 3, kind: input, shape index: {}]   ;;  %s4520_s4 = inlined_call_operand.vmem [shape: f32[1,256], index: 4, kind: input, shape index: {}]   ;;  %s4521_s5 = inlined_call_operand.hbm [shape: f32[32,256], index: 5, kind: input, shape index: {}]   ;;  %s4522_s6 = inlined_call_operand.hbm [shape: f32[32,256], index: 6, kind: input, shape index: {}]   ;;  %s4523_s7 = inlined_call_operand.hbm [shape: f32[32,256], index: 7, kind: input, shape index: {}]   ;;  %s4524_s8 = inlined_call_operand.hbm [shape: f32[32,256], index: 8, kind: output, shape index: {0}]   ;;  %s4525_s9 = inlined_call_operand.hbm [shape: f32[1,1], index: 9, kind: output, shape index: {1}]  }
   0x1   :  { %16 = vsyncpa [#allocation7], 0 }
   0x2   :  { %17 = vsyncpa [#allocation10], 0 }
   0x3   :  { %18 = vsyncpa [#allocation13], 0 }
   0x4   :  { %19 = vsyncpa [#allocation4], 0 }
   0x5   :  { %20 = vsyncpa [#allocation5], 0  ;;  %s4274_s30 = smov [#allocation6]  }
   0x6   :  { %s38_s10 = sshll.u32 %s4274_s30, 4  ;;  %s39_s10 = int_to_ptr.vmem [resolvable:$true] %s38_s10 }
   0x7   :  { %s4102_s11 = scalar_lea.vmem %s39_s10, 32768  ;;  %p4107_p1 = scmp.lt.s32.totalorder %s39_s10, %s39_s10 }
   0x8   :  { %p4103_p0 = scmp.ne.s32.totalorder %s39_s10, %s4102_s11  ;;  %p4108_p2 = scmp.lt.s32.totalorder %s4102_s11, %s4102_s11 }
   0xa   :  { %p4109_p3 = por %p4108_p2, %p4107_p1 }
   0xc   :  { %p4110_p4 = pnand %p4109_p3, %p4103_p0 }
   0xe   :  { %4113 = shalt.err (!%p4110_p4)
}
   0xf   :  { %s4275_s12 = smov 512   ;;  %s4276_s13 = smov 32  }
  0x10   :  { %44 = dma.hbm_to_vmem [thread:$0]  %s4517_s1, 32768, %s39_s10, [#allocation7], %s4275_s12, %s4275_s12, %s4276_s13  }
  0x11   :  { %s4277_s16 = smov [#allocation9]  }
  0x12   :  { %s60_s17 = sshll.u32 %s4277_s16, 4  ;;  %s61_s17 = int_to_ptr.vmem [resolvable:$true] %s60_s17 }
  0x13   :  { %s4122_s18 = scalar_lea.vmem %s61_s17, 16384  ;;  %p4127_p6 = scmp.lt.s32.totalorder %s61_s17, %s61_s17 }
  0x14   :  { %p4123_p5 = scmp.ne.s32.totalorder %s61_s17, %s4122_s18  ;;  %p4128_p7 = scmp.lt.s32.totalorder %s4122_s18, %s4122_s18 }
  0x16   :  { %p4129_p8 = por %p4128_p7, %p4127_p6 }
  0x18   :  { %p4130_p9 = pnand %p4129_p8, %p4123_p5 }
  0x1a   :  { %4133 = shalt.err (!%p4130_p9)
}
  0x1b   :  { %s4278_s19 = smov 128   ;;  %s4279_s20 = smov 8  }
  0x1c   :  { %66 = dma.hbm_to_vmem [thread:$0]  %s4519_s3, 16384, %s61_s17, [#allocation10], %s4278_s19, %s4278_s19, %s4279_s20  }
  0x1d   :  { %s4280_s23 = smov [#allocation12]   ;;  %s4281_s25 = smov [#allocation2]  }
  0x1e   :  { %s86_s24 = sshll.u32 %s4280_s23, 4  ;;  %s26_s1 = sshll.u32 %s4281_s25, 4  ;;  %s87_s24 = int_to_ptr.vmem [resolvable:$true] %s86_s24  ;;  %s27_s1 = int_to_ptr.vmem [resolvable:$true] %s26_s1 }
  0x1f   :  { %s4142_s26 = scalar_lea.vmem %s87_s24, 1024  ;;  %p4147_p11 = scmp.lt.s32.totalorder %s87_s24, %s87_s24 }
  0x20   :  { %p4143_p10 = scmp.ne.s32.totalorder %s87_s24, %s4142_s26  ;;  %p4148_p12 = scmp.lt.s32.totalorder %s4142_s26, %s4142_s26 }
  0x22   :  { %p4149_p13 = por %p4148_p12, %p4147_p11 }
  0x24   :  { %p4150_p0 = pnand %p4149_p13, %p4143_p10 }
  0x26   :  { %4153 = shalt.err (!%p4150_p0)
}
  0x27   :  { %s4282_s27 = smov 256   ;;  %s4283_s28 = smov 16  }
  0x28   :  { %92 = dma.hbm_to_vmem [thread:$0]  %s4522_s6, 1024, %s87_s24, [#allocation13], %s4282_s27, %s4282_s27, %s4283_s28  }
  0x29   :  { %s4162_s30 = scalar_lea.vmem %s27_s1, 1024  ;;  %p4167_p2 = scmp.lt.s32.totalorder %s27_s1, %s27_s1 }
  0x2a   :  { %p4163_p1 = scmp.ne.s32.totalorder %s27_s1, %s4162_s30  ;;  %p4168_p3 = scmp.lt.s32.totalorder %s4162_s30, %s4162_s30 }
  0x2c   :  { %p4169_p4 = por %p4168_p3, %p4167_p2 }
  0x2e   :  { %p4170_p5 = pnand %p4169_p4, %p4163_p1 }
  0x30   :  { %4173 = shalt.err (!%p4170_p5)
}
  0x31   :  { %32 = dma.hbm_to_vmem [thread:$0]  %s4516_s0, 1024, %s27_s1, [#allocation3], %s4282_s27, %s4282_s27, %s4283_s28  }
  0x32   :  { %s4284_s12 = smov [#allocation8]   ;;  %s4285_s14 = smov [#allocation11]  }
  0x33   :  { %s51_s13 = sshll.u32 %s4284_s12, 4  ;;  %s74_s15 = sshll.u32 %s4285_s14, 4  ;;  %s52_s13 = int_to_ptr.vmem [resolvable:$true] %s51_s13  ;;  %s75_s15 = int_to_ptr.vmem [resolvable:$true] %s74_s15 }
  0x34   :  { %s4182_s6 = scalar_lea.vmem %s52_s13, 128  ;;  %p4187_p7 = scmp.lt.s32.totalorder %s52_s13, %s52_s13 }
  0x35   :  { %p4183_p6 = scmp.ne.s32.totalorder %s52_s13, %s4182_s6  ;;  %p4188_p8 = scmp.lt.s32.totalorder %s4182_s6, %s4182_s6 }
  0x37   :  { %p4189_p9 = por %p4188_p8, %p4187_p7 }
  0x39   :  { %p4190_p10 = pnand %p4189_p9, %p4183_p6 }
  0x3b   :  { %4193 = shalt.err (!%p4190_p10)
}
  0x3c   :  { %54 = dma.hbm_to_vmem [thread:$0]  %s4518_s2, 128, %s52_s13, [#allocation7]  }
  0x3d   :  { %s4202_s18 = scalar_lea.vmem %s75_s15, 1024  ;;  %p4207_p12 = scmp.lt.s32.totalorder %s75_s15, %s75_s15 }
  0x3e   :  { %p4203_p11 = scmp.ne.s32.totalorder %s75_s15, %s4202_s18  ;;  %p4208_p13 = scmp.lt.s32.totalorder %s4202_s18, %s4202_s18 }
  0x40   :  { %p4209_p0 = por %p4208_p13, %p4207_p12 }
  0x42   :  { %p4210_p1 = pnand %p4209_p0, %p4203_p11 }
  0x44   :  { %4213 = shalt.err (!%p4210_p1)
}
  0x45   :  { %80 = dma.hbm_to_vmem [thread:$0]  %s4521_s5, 1024, %s75_s15, [#allocation10], %s4282_s27, %s4282_s27, %s4283_s28  }
  0x46   :  { %s4286_s20 = smov [#allocation14]  }
  0x47   :  { %s98_s21 = sshll.u32 %s4286_s20, 4  ;;  %s99_s21 = int_to_ptr.vmem [resolvable:$true] %s98_s21 }
  0x48   :  { %s4222_s22 = scalar_lea.vmem %s99_s21, 1024  ;;  %p4227_p3 = scmp.lt.s32.totalorder %s99_s21, %s99_s21 }
  0x49   :  { %p4223_p2 = scmp.ne.s32.totalorder %s99_s21, %s4222_s22  ;;  %p4228_p4 = scmp.lt.s32.totalorder %s4222_s22, %s4222_s22 }
  0x4b   :  { %p4229_p5 = por %p4228_p4, %p4227_p3 }
  0x4d   :  { %p4230_p6 = pnand %p4229_p5, %p4223_p2 }
  0x4f   :  { %4233 = shalt.err (!%p4230_p6)
}
  0x50   :  { %104 = dma.hbm_to_vmem [thread:$0]  %s4523_s7, 1024, %s99_s21, [#allocation13], %s4282_s27, %s4282_s27, %s4283_s28  }
  0x51   :  { %4262 = dma.done.wait [#allocation3], 1024  }
  0x52   :  { %4263 = vsyncadd [#allocation3], 4294966272 }
  0x53   :  { %4264 = dma.done.wait [#allocation7], 32896  }
  0x54   :  { %4265 = vsyncadd [#allocation7], 4294934400 }
  0x55   :  { %4266 = dma.done.wait [#allocation10], 17408  }
  0x56   :  { %4267 = vsyncadd [#allocation10], 4294949888 }
  0x57   :  { %4268 = dma.done.wait [#allocation13], 2048  }
  0x58   :  { %4269 = vsyncadd [#allocation13], 4294965248  ;;  %v190_v0 = vld [vmem:[#allocation6 + $0x1c0] sm:$0xff]  ;;  %v4374_v59 = vld [vmem:[#allocation2 + $0xc] ss:$16 sps:$4 sm:$0xff]  }
  0x59   :  { %v194_v1 = vld [vmem:[#allocation6 + $0x1e0] sm:$0xff]  ;;  %1837 = vmatprep.mubr.bf16.mxu1 %v4374_v59 }
  0x5a   :  { %v318_v2 = vld [vmem:[#allocation6 + $0x5c0] sm:$0xff]  ;;  %v3522_v3 = vcombine.high %v190_v0, %v194_v1  ;;  %v3521_v5 = vcombine.low %v190_v0, %v194_v1 }
  0x5b   :  { %v322_v4 = vld [vmem:[#allocation6 + $0x5e0] sm:$0xff] }
  0x5c   :  { %v182_v6 = vld [vmem:[#allocation6 + $0x180] sm:$0xff]  ;;  %v3650_v8 = vcombine.high %v318_v2, %v322_v4  ;;  %v3649_v9 = vcombine.low %v318_v2, %v322_v4  ;;  %1752 = vmatprep.subr.bf16.mxu0 %v3522_v3 }
  0x5d   :  { %v186_v7 = vld [vmem:[#allocation6 + $0x1a0] sm:$0xff]  ;;  %1753 = vmatpush1.bf16.msra.mxu0 %v3521_v5 }
  0x5e   :  { %v3514_v10 = vcombine.high %v182_v6, %v186_v7  ;;  %v310_v11 = vld [vmem:[#allocation6 + $0x580] sm:$0xff]  ;;  %1805 = vmatprep.subr.bf16.mxu1 %v3650_v8  ;;  %v3513_v18 = vcombine.low %v182_v6, %v186_v7 }
  0x5f   :  { %v314_v12 = vld [vmem:[#allocation6 + $0x5a0] sm:$0xff]  ;;  %1806 = vmatpush1.bf16.msra.mxu1 %v3649_v9 }
  0x60   :  { %v174_v13 = vld [vmem:[#allocation6 + $0x140] sm:$0xff]  ;;  %v3642_v14 = vcombine.high %v310_v11, %v314_v12  ;;  %1754 = vmatprep.subr.bf16.mxu0 %v3514_v10  ;;  %v3641_v19 = vcombine.low %v310_v11, %v314_v12 }
  0x61   :  { %v178_v15 = vld [vmem:[#allocation6 + $0x160] sm:$0xff]  ;;  %1755 = vmatpush1.bf16.msra.mxu0 %v3513_v18 }
  0x62   :  { %v302_v16 = vld [vmem:[#allocation6 + $0x540] sm:$0xff]  ;;  %v3506_v20 = vcombine.high %v174_v13, %v178_v15  ;;  %1807 = vmatprep.subr.bf16.mxu1 %v3642_v14  ;;  %v3505_v26 = vcombine.low %v174_v13, %v178_v15 }
  0x63   :  { %v306_v17 = vld [vmem:[#allocation6 + $0x560] sm:$0xff]  ;;  %1808 = vmatpush1.bf16.msra.mxu1 %v3641_v19 }
  0x64   :  { %v3634_v21 = vcombine.high %v302_v16, %v306_v17  ;;  %v166_v22 = vld [vmem:[#allocation6 + $0x100] sm:$0xff]  ;;  %1756 = vmatprep.subr.bf16.mxu0 %v3506_v20  ;;  %v3633_v27 = vcombine.low %v302_v16, %v306_v17 }
  0x65   :  { %v170_v23 = vld [vmem:[#allocation6 + $0x120] sm:$0xff]  ;;  %1757 = vmatpush1.bf16.msra.mxu0 %v3505_v26 }
  0x66   :  { %v294_v24 = vld [vmem:[#allocation6 + $0x500] sm:$0xff]  ;;  %v3498_v28 = vcombine.high %v166_v22, %v170_v23  ;;  %1809 = vmatprep.subr.bf16.mxu1 %v3634_v21  ;;  %v3497_v34 = vcombine.low %v166_v22, %v170_v23 }
  0x67   :  { %v298_v25 = vld [vmem:[#allocation6 + $0x520] sm:$0xff]  ;;  %1810 = vmatpush1.bf16.msra.mxu1 %v3633_v27 }
  0x68   :  { %v3626_v29 = vcombine.high %v294_v24, %v298_v25  ;;  %v158_v30 = vld [vmem:[#allocation6 + $0xc0] sm:$0xff]  ;;  %1758 = vmatprep.subr.bf16.mxu0 %v3498_v28  ;;  %v3625_v35 = vcombine.low %v294_v24, %v298_v25 }
  0x69   :  { %v162_v31 = vld [vmem:[#allocation6 + $0xe0] sm:$0xff]  ;;  %1759 = vmatpush1.bf16.msra.mxu0 %v3497_v34 }
  0x6a   :  { %v286_v32 = vld [vmem:[#allocation6 + $0x4c0] sm:$0xff]  ;;  %v3490_v36 = vcombine.high %v158_v30, %v162_v31  ;;  %1811 = vmatprep.subr.bf16.mxu1 %v3626_v29  ;;  %v3489_v42 = vcombine.low %v158_v30, %v162_v31 }
  0x6b   :  { %v290_v33 = vld [vmem:[#allocation6 + $0x4e0] sm:$0xff]  ;;  %1812 = vmatpush1.bf16.msra.mxu1 %v3625_v35 }
  0x6c   :  { %v3618_v37 = vcombine.high %v286_v32, %v290_v33  ;;  %v150_v38 = vld [vmem:[#allocation6 + $0x80] sm:$0xff]  ;;  %1760 = vmatprep.subr.bf16.mxu0 %v3490_v36  ;;  %v3617_v43 = vcombine.low %v286_v32, %v290_v33 }
  0x6d   :  { %v154_v39 = vld [vmem:[#allocation6 + $0xa0] sm:$0xff]  ;;  %1761 = vmatpush1.bf16.msra.mxu0 %v3489_v42 }
  0x6e   :  { %v278_v40 = vld [vmem:[#allocation6 + $0x480] sm:$0xff]  ;;  %v3482_v44 = vcombine.high %v150_v38, %v154_v39  ;;  %1813 = vmatprep.subr.bf16.mxu1 %v3618_v37  ;;  %v3481_v50 = vcombine.low %v150_v38, %v154_v39 }
  0x6f   :  { %v282_v41 = vld [vmem:[#allocation6 + $0x4a0] sm:$0xff]  ;;  %1814 = vmatpush1.bf16.msra.mxu1 %v3617_v43 }
  0x70   :  { %v3610_v45 = vcombine.high %v278_v40, %v282_v41  ;;  %v142_v46 = vld [vmem:[#allocation6 + $0x40] sm:$0xff]  ;;  %1762 = vmatprep.subr.bf16.mxu0 %v3482_v44  ;;  %v3609_v52 = vcombine.low %v278_v40, %v282_v41 }
  0x71   :  { %v146_v47 = vld [vmem:[#allocation6 + $0x60] sm:$0xff]  ;;  %1763 = vmatpush1.bf16.msra.mxu0 %v3481_v50 }
  0x72   :  { %v270_v48 = vld [vmem:[#allocation6 + $0x440] sm:$0xff]  ;;  %v3474_v53 = vcombine.high %v142_v46, %v146_v47  ;;  %1815 = vmatprep.subr.bf16.mxu1 %v3610_v45  ;;  %v3473_v60 = vcombine.low %v142_v46, %v146_v47 }
  0x73   :  { %v274_v49 = vld [vmem:[#allocation6 + $0x460] sm:$0xff]  ;;  %1816 = vmatpush1.bf16.msra.mxu1 %v3609_v52 }
  0x74   :  { %v134_v51 = vld [vmem:[#allocation6] sm:$0xff]  ;;  %v3602_v55 = vcombine.high %v270_v48, %v274_v49  ;;  %1764 = vmatprep.subr.bf16.mxu0 %v3474_v53  ;;  %v3601_v61 = vcombine.low %v270_v48, %v274_v49 }
  0x75   :  { %v138_v54 = vld [vmem:[#allocation6 + $0x20] sm:$0xff]  ;;  %1765 = vmatpush1.bf16.msra.mxu0 %v3473_v60 }
  0x76   :  { %v4372_v56 = vld [vmem:[#allocation2 + $0x4] ss:$16 sps:$4 sm:$0xff]   ;;  %v3466_v62 = vcombine.high %v134_v51, %v138_v54  ;;  %1817 = vmatprep.subr.bf16.mxu1 %v3602_v55  ;;  %v3465_v4 = vcombine.low %v134_v51, %v138_v54 }
  0x77   :  { %v262_v57 = vld [vmem:[#allocation6 + $0x400] sm:$0xff]  ;;  %1784 = vmatprep.mubr.bf16.mxu0 %v4372_v56  ;;  %1818 = vmatpush1.bf16.msra.mxu1 %v3601_v61 }
  0x78   :  { %v266_v58 = vld [vmem:[#allocation6 + $0x420] sm:$0xff]  ;;  %1766 = vmatprep.subr.bf16.mxu0 %v3466_v62 }
  0x79   :  { %v3594_v63 = vcombine.high %v262_v57, %v266_v58  ;;  %v254_v0 = vld [vmem:[#allocation6 + $0x3c0] sm:$0xff]  ;;  %v3593_v5 = vcombine.low %v262_v57, %v266_v58  ;;  %1767 = vmatpush1.bf16.msra.mxu0 %v3465_v4  ;;  %v319_v4 = vld [vmem:[#allocation6 + $0x5c8] sm:$0xff] }
  0x7a   :  { %v258_v1 = vld [vmem:[#allocation6 + $0x3e0] sm:$0xff] }
  0x7b   :  { %v382_v2 = vld [vmem:[#allocation6 + $0x7c0] sm:$0xff]  ;;  %v3586_v6 = vcombine.high %v254_v0, %v258_v1  ;;  %1819 = vmatprep.subr.bf16.mxu1 %v3594_v63  ;;  %v3585_v12 = vcombine.low %v254_v0, %v258_v1 }
  0x7c   :  { %v386_v3 = vld [vmem:[#allocation6 + $0x7e0] sm:$0xff]  ;;  %1820 = vmatpush1.bf16.msra.mxu1 %v3593_v5  ;;  %v323_v5 = vld [vmem:[#allocation6 + $0x5e8] sm:$0xff] }
  0x7d   :  { %v3714_v7 = vcombine.high %v382_v2, %v386_v3  ;;  %v246_v8 = vld [vmem:[#allocation6 + $0x380] sm:$0xff]  ;;  %1768 = vmatprep.subr.bf16.mxu0 %v3586_v6  ;;  %v3713_v13 = vcombine.low %v382_v2, %v386_v3  ;;  %v191_v2 = vld [vmem:[#allocation6 + $0x1c8] sm:$0xff] }
  0x7e   :  { %v250_v9 = vld [vmem:[#allocation6 + $0x3a0] sm:$0xff]  ;;  %1769 = vmatpush2.bf16.msra.mxu0 %v3585_v12  ;;  %v195_v3 = vld [vmem:[#allocation6 + $0x1e8] sm:$0xff] }
  0x7f   :  { %v374_v10 = vld [vmem:[#allocation6 + $0x780] sm:$0xff]  ;;  %v3578_v14 = vcombine.high %v246_v8, %v250_v9  ;;  %1821 = vmatprep.subr.bf16.mxu1 %v3714_v7  ;;  %v3577_v20 = vcombine.low %v246_v8, %v250_v9  ;;  %v3524_v8 = vcombine.high %v191_v2, %v195_v3  ;;  %v3652_v9 = vcombine.high %v319_v4, %v323_v5 }
  0x80   :  { %v378_v11 = vld [vmem:[#allocation6 + $0x7a0] sm:$0xff]  ;;  %1822 = vmatpush2.bf16.msra.mxu1 %v3713_v13  ;;  %v311_v13 = vld [vmem:[#allocation6 + $0x588] sm:$0xff] }
  0x81   :  { %v3706_v15 = vcombine.high %v374_v10, %v378_v11  ;;  %v238_v16 = vld [vmem:[#allocation6 + $0x340] sm:$0xff]  ;;  %1770 = vmatprep.subr.bf16.mxu0 %v3578_v14  ;;  %v3705_v21 = vcombine.low %v374_v10, %v378_v11  ;;  %v183_v10 = vld [vmem:[#allocation6 + $0x188] sm:$0xff] }
  0x82   :  { %v242_v17 = vld [vmem:[#allocation6 + $0x360] sm:$0xff]  ;;  %1771 = vmatpush2.bf16.msra.mxu0 %v3577_v20  ;;  %v187_v11 = vld [vmem:[#allocation6 + $0x1a8] sm:$0xff] }
  0x83   :  { %v366_v18 = vld [vmem:[#allocation6 + $0x740] sm:$0xff]  ;;  %v3570_v22 = vcombine.high %v238_v16, %v242_v17  ;;  %1823 = vmatprep.subr.bf16.mxu1 %v3706_v15  ;;  %v3569_v28 = vcombine.low %v238_v16, %v242_v17  ;;  %v315_v14 = vld [vmem:[#allocation6 + $0x5a8] sm:$0xff]  ;;  %v3523_v16 = vcombine.low %v191_v2, %v195_v3  ;;  %v3651_v17 = vcombine.low %v319_v4, %v323_v5 }
  0x84   :  { %v370_v19 = vld [vmem:[#allocation6 + $0x760] sm:$0xff]  ;;  %1824 = vmatpush2.bf16.msra.mxu1 %v3705_v21  ;;  %v4380_v15 = vld [vmem:[#allocation2 + $0x8] ss:$16 sps:$4 sm:$0xff]  }
  0x85   :  { %v3698_v23 = vcombine.high %v366_v18, %v370_v19  ;;  %v230_v24 = vld [vmem:[#allocation6 + $0x300] sm:$0xff]  ;;  %1772 = vmatprep.subr.bf16.mxu0 %v3570_v22  ;;  %v3697_v29 = vcombine.low %v366_v18, %v370_v19  ;;  %v3516_v18 = vcombine.high %v183_v10, %v187_v11  ;;  %v3644_v19 = vcombine.high %v311_v13, %v315_v14  ;;  %v175_v20 = vld [vmem:[#allocation6 + $0x148] sm:$0xff] }
  0x86   :  { %v234_v25 = vld [vmem:[#allocation6 + $0x320] sm:$0xff]  ;;  %1773 = vmatpush2.bf16.msra.mxu0 %v3569_v28  ;;  %v179_v21 = vld [vmem:[#allocation6 + $0x168] sm:$0xff] }
  0x87   :  { %v358_v26 = vld [vmem:[#allocation6 + $0x700] sm:$0xff]  ;;  %v3562_v30 = vcombine.high %v230_v24, %v234_v25  ;;  %1825 = vmatprep.subr.bf16.mxu1 %v3698_v23  ;;  %v3561_v36 = vcombine.low %v230_v24, %v234_v25  ;;  %v303_v23 = vld [vmem:[#allocation6 + $0x548] sm:$0xff]  ;;  %v3508_v28 = vcombine.high %v175_v20, %v179_v21 }
  0x88   :  { %v362_v27 = vld [vmem:[#allocation6 + $0x720] sm:$0xff]  ;;  %1826 = vmatpush2.bf16.msra.mxu1 %v3697_v29  ;;  %v307_v24 = vld [vmem:[#allocation6 + $0x568] sm:$0xff] }
  0x89   :  { %v3690_v31 = vcombine.high %v358_v26, %v362_v27  ;;  %v222_v32 = vld [vmem:[#allocation6 + $0x2c0] sm:$0xff]  ;;  %1774 = vmatprep.subr.bf16.mxu0 %v3562_v30  ;;  %v3689_v37 = vcombine.low %v358_v26, %v362_v27  ;;  %v4385_v25 = vld [vmem:[#allocation2 + $0x2c] ss:$16 sps:$4 sm:$0xff]   ;;  %v3515_v26 = vcombine.low %v183_v10, %v187_v11  ;;  %v3643_v27 = vcombine.low %v311_v13, %v315_v14 }
  0x8a   :  { %v226_v33 = vld [vmem:[#allocation6 + $0x2e0] sm:$0xff]  ;;  %1775 = vmatpush2.bf16.msra.mxu0 %v3561_v36  ;;  %v3636_v29 = vcombine.high %v303_v23, %v307_v24  ;;  %v167_v30 = vld [vmem:[#allocation6 + $0x108] sm:$0xff]  ;;  %v3507_v36 = vcombine.low %v175_v20, %v179_v21 }
  0x8b   :  { %v350_v34 = vld [vmem:[#allocation6 + $0x6c0] sm:$0xff]  ;;  %v3554_v38 = vcombine.high %v222_v32, %v226_v33  ;;  %1827 = vmatprep.subr.bf16.mxu1 %v3690_v31  ;;  %v3553_v44 = vcombine.low %v222_v32, %v226_v33  ;;  %v171_v31 = vld [vmem:[#allocation6 + $0x128] sm:$0xff] }
  0x8c   :  { %v354_v35 = vld [vmem:[#allocation6 + $0x6e0] sm:$0xff]  ;;  %1828 = vmatpush2.bf16.msra.mxu1 %v3689_v37  ;;  %v295_v32 = vld [vmem:[#allocation6 + $0x508] sm:$0xff]  ;;  %v3635_v37 = vcombine.low %v303_v23, %v307_v24 }
  0x8d   :  { %v3682_v39 = vcombine.high %v350_v34, %v354_v35  ;;  %v214_v40 = vld [vmem:[#allocation6 + $0x280] sm:$0xff]  ;;  %1776 = vmatprep.subr.bf16.mxu0 %v3554_v38  ;;  %v3681_v45 = vcombine.low %v350_v34, %v354_v35  ;;  %v299_v33 = vld [vmem:[#allocation6 + $0x528] sm:$0xff]  ;;  %v3500_v38 = vcombine.high %v167_v30, %v171_v31 }
  0x8e   :  { %v218_v41 = vld [vmem:[#allocation6 + $0x2a0] sm:$0xff]  ;;  %1777 = vmatpush2.bf16.msra.mxu0 %v3553_v44  ;;  %v4392_v35 = vld [vmem:[#allocation2 + $0x28] ss:$16 sps:$4 sm:$0xff]   ;;  %v3499_v44 = vcombine.low %v167_v30, %v171_v31 }
  0x8f   :  { %v342_v42 = vld [vmem:[#allocation6 + $0x680] sm:$0xff]  ;;  %v3546_v46 = vcombine.high %v214_v40, %v218_v41  ;;  %1829 = vmatprep.subr.bf16.mxu1 %v3682_v39  ;;  %v3545_v52 = vcombine.low %v214_v40, %v218_v41  ;;  %v159_v39 = vld [vmem:[#allocation6 + $0xc8] sm:$0xff] }
  0x90   :  { %v346_v43 = vld [vmem:[#allocation6 + $0x6a0] sm:$0xff]  ;;  %1830 = vmatpush2.bf16.msra.mxu1 %v3681_v45  ;;  %v163_v40 = vld [vmem:[#allocation6 + $0xe8] sm:$0xff]  ;;  %v3627_v45 = vcombine.low %v295_v32, %v299_v33 }
  0x91   :  { %v3674_v47 = vcombine.high %v342_v42, %v346_v43  ;;  %v206_v48 = vld [vmem:[#allocation6 + $0x240] sm:$0xff]  ;;  %1778 = vmatprep.subr.bf16.mxu0 %v3546_v46  ;;  %v3673_v53 = vcombine.low %v342_v42, %v346_v43  ;;  %v287_v41 = vld [vmem:[#allocation6 + $0x4c8] sm:$0xff]  ;;  %v3628_v42 = vcombine.high %v295_v32, %v299_v33  ;;  %v3492_v46 = vcombine.high %v159_v39, %v163_v40 }
  0x92   :  { %v210_v49 = vld [vmem:[#allocation6 + $0x260] sm:$0xff]  ;;  %1779 = vmatpush2.bf16.msra.mxu0 %v3545_v52  ;;  %v291_v43 = vld [vmem:[#allocation6 + $0x4e8] sm:$0xff]  ;;  %v3491_v52 = vcombine.low %v159_v39, %v163_v40 }
  0x93   :  { %v334_v50 = vld [vmem:[#allocation6 + $0x640] sm:$0xff]  ;;  %v3538_v54 = vcombine.high %v206_v48, %v210_v49  ;;  %1831 = vmatprep.subr.bf16.mxu1 %v3674_v47  ;;  %v3537_v62 = vcombine.low %v206_v48, %v210_v49  ;;  %v151_v47 = vld [vmem:[#allocation6 + $0x88] sm:$0xff] }
  0x94   :  { %v338_v51 = vld [vmem:[#allocation6 + $0x660] sm:$0xff]  ;;  %1832 = vmatpush2.bf16.msra.mxu1 %v3673_v53  ;;  %v155_v48 = vld [vmem:[#allocation6 + $0xa8] sm:$0xff]  ;;  %v3619_v53 = vcombine.low %v287_v41, %v291_v43 }
  0x95   :  { %v3666_v55 = vcombine.high %v334_v50, %v338_v51  ;;  %v198_v57 = vld [vmem:[#allocation6 + $0x200] sm:$0xff]  ;;  %1780 = vmatprep.subr.bf16.mxu0 %v3538_v54  ;;  %v3665_v63 = vcombine.low %v334_v50, %v338_v51  ;;  %v279_v49 = vld [vmem:[#allocation6 + $0x488] sm:$0xff]  ;;  %v3620_v50 = vcombine.high %v287_v41, %v291_v43  ;;  %v3484_v54 = vcombine.high %v151_v47, %v155_v48 }
  0x96   :  { %v202_v58 = vld [vmem:[#allocation6 + $0x220] sm:$0xff]  ;;  %1781 = vmatpush2.bf16.msra.mxu0 %v3537_v62  ;;  %v283_v51 = vld [vmem:[#allocation6 + $0x4a8] sm:$0xff]  ;;  %v3483_v62 = vcombine.low %v151_v47, %v155_v48 }
  0x97   :  { %v326_v60 = vld [vmem:[#allocation6 + $0x600] sm:$0xff]  ;;  %v3530_v0 = vcombine.high %v198_v57, %v202_v58  ;;  %1833 = vmatprep.subr.bf16.mxu1 %v3666_v55  ;;  %v3529_v6 = vcombine.low %v198_v57, %v202_v58  ;;  %v143_v55 = vld [vmem:[#allocation6 + $0x48] sm:$0xff] }
  0x98   :  { %v330_v61 = vld [vmem:[#allocation6 + $0x620] sm:$0xff]  ;;  %1834 = vmatpush2.bf16.msra.mxu1 %v3665_v63  ;;  %v147_v57 = vld [vmem:[#allocation6 + $0x68] sm:$0xff]  ;;  %v3611_v63 = vcombine.low %v279_v49, %v283_v51 }
  0x99   :  { %v3658_v1 = vcombine.high %v326_v60, %v330_v61  ;;  %1782 = vmatprep.subr.bf16.mxu0 %v3530_v0  ;;  %v3657_v7 = vcombine.low %v326_v60, %v330_v61  ;;  %v4378_v12 = vld [vmem:[#allocation2] ss:$16 sps:$4 sm:$0xff]   ;;  %v4382_v22 = vld [vmem:[#allocation2 + $0x24] ss:$16 sps:$4 sm:$0xff]   ;;  %v271_v58 = vld [vmem:[#allocation6 + $0x448] sm:$0xff]  ;;  %v3612_v60 = vcombine.high %v279_v49, %v283_v51  ;;  %v3475_v4 = vcombine.low %v143_v55, %v147_v57 }
  0x9a   :  { %1783 = vmatpush2.bf16.msra.mxu0 %v3529_v6  ;;  %v4389_v34 = vld [vmem:[#allocation2 + $0x20] ss:$16 sps:$4 sm:$0xff]   ;;  %v275_v61 = vld [vmem:[#allocation6 + $0x468] sm:$0xff] }
  0x9b   :  { %1835 = vmatprep.subr.bf16.mxu1 %v3658_v1  ;;  %1858 = vmatprep.subr.bf16.mxu0 %v3524_v8  ;;  %v135_v0 = vld [vmem:[#allocation6 + $0x8] sm:$0xff]  ;;  %v3604_v2 = vcombine.high %v271_v58, %v275_v61  ;;  %v3603_v5 = vcombine.low %v271_v58, %v275_v61 }
  0x9c   :  { %1836 = vmatpush2.bf16.msra.mxu1 %v3657_v7  ;;  %v263_v1 = vld [vmem:[#allocation6 + $0x408] sm:$0xff] }
  0x9d   :  { %1911 = vmatprep.subr.bf16.mxu1 %v3652_v9  ;;  %1785 = vmatmul.mubr.bf16.vlgmr.msra.gmra.mxu0 %v4378_v12  ;;  %v267_v3 = vld [vmem:[#allocation6 + $0x428] sm:$0xff] }
  0x9e   :  { %1859 = vmatpush1.bf16.msra.mxu0 %v3523_v16  ;;  %1794 = vmatprep.mubr.bf16.mxu0 %v4382_v22  ;;  %v255_v7 = vld [vmem:[#allocation6 + $0x3c8] sm:$0xff]  ;;  %v3596_v10 = vcombine.high %v263_v1, %v267_v3  ;;  %v3595_v14 = vcombine.low %v263_v1, %v267_v3 }
  0x9f   :  { %1838 = vmatmul.mubr.bf16.vlgmr.msra.gmra.mxu1 %v4380_v15  ;;  %1860 = vmatprep.subr.bf16.mxu0 %v3516_v18  ;;  %v259_v8 = vld [vmem:[#allocation6 + $0x3e8] sm:$0xff] }
  0xa0   :  { %1912 = vmatpush1.bf16.msra.mxu1 %v3651_v17  ;;  %1847 = vmatprep.mubr.bf16.mxu1 %v4385_v25  ;;  %v383_v9 = vld [vmem:[#allocation6 + $0x7c8] sm:$0xff]  ;;  %v3588_v16 = vcombine.high %v255_v7, %v259_v8  ;;  %v3587_v23 = vcombine.low %v255_v7, %v259_v8 }
  0xa1   :  { %1913 = vmatprep.subr.bf16.mxu1 %v3644_v19  ;;  %v387_v11 = vld [vmem:[#allocation6 + $0x7e8] sm:$0xff] }
  0xa2   :  { %1861 = vmatpush1.bf16.msra.mxu0 %v3515_v26  ;;  %v247_v17 = vld [vmem:[#allocation6 + $0x388] sm:$0xff]  ;;  %v3716_v20 = vcombine.high %v383_v9, %v387_v11  ;;  %v3715_v24 = vcombine.low %v383_v9, %v387_v11 }
  0xa3   :  { %1862 = vmatprep.subr.bf16.mxu0 %v3508_v28  ;;  %v251_v18 = vld [vmem:[#allocation6 + $0x3a8] sm:$0xff] }
  0xa4   :  { %1914 = vmatpush1.bf16.msra.mxu1 %v3643_v27  ;;  %v375_v19 = vld [vmem:[#allocation6 + $0x788] sm:$0xff]  ;;  %v3580_v26 = vcombine.high %v247_v17, %v251_v18  ;;  %v3579_v32 = vcombine.low %v247_v17, %v251_v18  ;;  %v320_v17 = vld [vmem:[#allocation6 + $0x5d0] sm:$0xff] }
  0xa5   :  { %1915 = vmatprep.subr.bf16.mxu1 %v3636_v29  ;;  %1795 = vmatmul.mubr.bf16.gmra.mxu0 %v4389_v34  ;;  %v379_v21 = vld [vmem:[#allocation6 + $0x7a8] sm:$0xff] }
  0xa6   :  { %1863 = vmatpush1.bf16.msra.mxu0 %v3507_v36  ;;  %1890 = vmatprep.mubr.bf16.mxu0 %v4372_v56  ;;  %v3476_v56 = vcombine.high %v143_v55, %v147_v57  ;;  %v239_v27 = vld [vmem:[#allocation6 + $0x348] sm:$0xff]  ;;  %v3708_v30 = vcombine.high %v375_v19, %v379_v21  ;;  %v3707_v33 = vcombine.low %v375_v19, %v379_v21  ;;  %v324_v19 = vld [vmem:[#allocation6 + $0x5f0] sm:$0xff] }
  0xa7   :  { %1848 = vmatmul.mubr.bf16.gmra.mxu1 %v4392_v35  ;;  %1864 = vmatprep.subr.bf16.mxu0 %v3500_v38  ;;  %v243_v28 = vld [vmem:[#allocation6 + $0x368] sm:$0xff] }
  0xa8   :  { %1916 = vmatpush1.bf16.msra.mxu1 %v3635_v37  ;;  %1943 = vmatprep.mubr.bf16.mxu1 %v4374_v59  ;;  %v139_v59 = vld [vmem:[#allocation6 + $0x28] sm:$0xff]  ;;  %v3572_v36 = vcombine.high %v239_v27, %v243_v28 }
  0xa9   :  { %1917 = vmatprep.subr.bf16.mxu1 %v3628_v42  ;;  %v3468_v6 = vcombine.high %v135_v0, %v139_v59  ;;  %v3467_v13 = vcombine.low %v135_v0, %v139_v59  ;;  %v367_v29 = vld [vmem:[#allocation6 + $0x748] sm:$0xff]  ;;  %v3571_v42 = vcombine.low %v239_v27, %v243_v28  ;;  %v312_v27 = vld [vmem:[#allocation6 + $0x590] sm:$0xff]  ;;  %v3654_v28 = vcombine.high %v320_v17, %v324_v19 }
  0xaa   :  { %1865 = vmatpush1.bf16.msra.mxu0 %v3499_v44  ;;  %v371_v31 = vld [vmem:[#allocation6 + $0x768] sm:$0xff] }
  0xab   :  { %1866 = vmatprep.subr.bf16.mxu0 %v3492_v46  ;;  %v231_v37 = vld [vmem:[#allocation6 + $0x308] sm:$0xff]  ;;  %v3700_v40 = vcombine.high %v367_v29, %v371_v31  ;;  %v3699_v43 = vcombine.low %v367_v29, %v371_v31  ;;  %v316_v29 = vld [vmem:[#allocation6 + $0x5b0] sm:$0xff] }
  0xac   :  { %1918 = vmatpush1.bf16.msra.mxu1 %v3627_v45  ;;  %v235_v38 = vld [vmem:[#allocation6 + $0x328] sm:$0xff]  ;;  %v176_v31 = vld [vmem:[#allocation6 + $0x150] sm:$0xff] }
  0xad   :  { %1919 = vmatprep.subr.bf16.mxu1 %v3620_v50  ;;  %v359_v39 = vld [vmem:[#allocation6 + $0x708] sm:$0xff]  ;;  %v3564_v44 = vcombine.high %v231_v37, %v235_v38  ;;  %v3563_v50 = vcombine.low %v231_v37, %v235_v38  ;;  %v3646_v37 = vcombine.high %v312_v27, %v316_v29  ;;  %v304_v38 = vld [vmem:[#allocation6 + $0x550] sm:$0xff] }
  0xae   :  { %1867 = vmatpush1.bf16.msra.mxu0 %v3491_v52  ;;  %v363_v41 = vld [vmem:[#allocation6 + $0x728] sm:$0xff] }
  0xaf   :  { %1868 = vmatprep.subr.bf16.mxu0 %v3484_v54  ;;  %v223_v45 = vld [vmem:[#allocation6 + $0x2c8] sm:$0xff]  ;;  %v3692_v48 = vcombine.high %v359_v39, %v363_v41  ;;  %v3691_v51 = vcombine.low %v359_v39, %v363_v41  ;;  %v308_v39 = vld [vmem:[#allocation6 + $0x570] sm:$0xff]  ;;  %v3645_v41 = vcombine.low %v312_v27, %v316_v29 }
  0xb0   :  { %1920 = vmatpush1.bf16.msra.mxu1 %v3619_v53  ;;  %v227_v46 = vld [vmem:[#allocation6 + $0x2e8] sm:$0xff]  ;;  %v252_v29 = vld [vmem:[#allocation6 + $0x3b0] sm:$0xff] }
  0xb1   :  { %1921 = vmatprep.subr.bf16.mxu1 %v3612_v60  ;;  %v351_v47 = vld [vmem:[#allocation6 + $0x6c8] sm:$0xff]  ;;  %v3556_v52 = vcombine.high %v223_v45, %v227_v46  ;;  %v3555_v60 = vcombine.low %v223_v45, %v227_v46  ;;  %v172_v45 = vld [vmem:[#allocation6 + $0x130] sm:$0xff] }
  0xb2   :  { %1869 = vmatpush1.bf16.msra.mxu0 %v3483_v62  ;;  %v355_v49 = vld [vmem:[#allocation6 + $0x6e8] sm:$0xff]  ;;  %v296_v46 = vld [vmem:[#allocation6 + $0x510] sm:$0xff] }
  0xb3   :  { %1870 = vmatprep.subr.bf16.mxu0 %v3476_v56  ;;  %v215_v53 = vld [vmem:[#allocation6 + $0x288] sm:$0xff]  ;;  %v3684_v57 = vcombine.high %v351_v47, %v355_v49  ;;  %v3683_v61 = vcombine.low %v351_v47, %v355_v49  ;;  %v300_v47 = vld [vmem:[#allocation6 + $0x530] sm:$0xff] }
  0xb4   :  { %1922 = vmatpush1.bf16.msra.mxu1 %v3611_v63  ;;  %v219_v54 = vld [vmem:[#allocation6 + $0x2a8] sm:$0xff]  ;;  %v3630_v49 = vcombine.high %v296_v46, %v300_v47 }
  0xb5   :  { %1923 = vmatprep.subr.bf16.mxu1 %v3604_v2  ;;  %v343_v55 = vld [vmem:[#allocation6 + $0x688] sm:$0xff]  ;;  %v3548_v62 = vcombine.high %v215_v53, %v219_v54  ;;  %v3547_v2 = vcombine.low %v215_v53, %v219_v54  ;;  %v3629_v53 = vcombine.low %v296_v46, %v300_v47  ;;  %v232_v46 = vld [vmem:[#allocation6 + $0x310] sm:$0xff] }
  0xb6   :  { %1871 = vmatpush1.bf16.msra.mxu0 %v3475_v4  ;;  %v347_v58 = vld [vmem:[#allocation6 + $0x6a8] sm:$0xff]  ;;  %v236_v47 = vld [vmem:[#allocation6 + $0x330] sm:$0xff] }
  0xb7   :  { %1872 = vmatprep.subr.bf16.mxu0 %v3468_v6  ;;  %v207_v63 = vld [vmem:[#allocation6 + $0x248] sm:$0xff]  ;;  %v3676_v59 = vcombine.high %v343_v55, %v347_v58  ;;  %v3675_v3 = vcombine.low %v343_v55, %v347_v58  ;;  %v156_v58 = vld [vmem:[#allocation6 + $0xb0] sm:$0xff] }
  0xb8   :  { %1924 = vmatpush1.bf16.msra.mxu1 %v3603_v5  ;;  %v211_v56 = vld [vmem:[#allocation6 + $0x268] sm:$0xff] }
  0xb9   :  { %1925 = vmatprep.subr.bf16.mxu1 %v3596_v10  ;;  %v335_v0 = vld [vmem:[#allocation6 + $0x648] sm:$0xff]  ;;  %v3540_v4 = vcombine.high %v207_v63, %v211_v56  ;;  %v3539_v10 = vcombine.low %v207_v63, %v211_v56 }
  0xba   :  { %1873 = vmatpush1.bf16.msra.mxu0 %v3467_v13  ;;  %v339_v1 = vld [vmem:[#allocation6 + $0x668] sm:$0xff] }
  0xbb   :  { %1874 = vmatprep.subr.bf16.mxu0 %v3588_v16  ;;  %v199_v5 = vld [vmem:[#allocation6 + $0x208] sm:$0xff]  ;;  %v3668_v8 = vcombine.high %v335_v0, %v339_v1  ;;  %v3667_v11 = vcombine.low %v335_v0, %v339_v1  ;;  %v196_v16 = vld [vmem:[#allocation6 + $0x1f0] sm:$0xff] }
  0xbc   :  { %1926 = vmatpush1.bf16.msra.mxu1 %v3595_v14  ;;  %v203_v6 = vld [vmem:[#allocation6 + $0x228] sm:$0xff]  ;;  %v192_v14 = vld [vmem:[#allocation6 + $0x1d0] sm:$0xff] }
  0xbd   :  { %1927 = vmatprep.subr.bf16.mxu1 %v3716_v20  ;;  %v327_v7 = vld [vmem:[#allocation6 + $0x608] sm:$0xff]  ;;  %v3532_v13 = vcombine.high %v199_v5, %v203_v6  ;;  %v3531_v20 = vcombine.low %v199_v5, %v203_v6  ;;  %v148_v1 = vld [vmem:[#allocation6 + $0x70] sm:$0xff] }
  0xbe   :  { %1875 = vmatpush2.bf16.msra.mxu0 %v3587_v23  ;;  %v331_v9 = vld [vmem:[#allocation6 + $0x628] sm:$0xff]  ;;  %v3526_v23 = vcombine.high %v192_v14, %v196_v16 }
  0xbf   :  { %1876 = vmatprep.subr.bf16.mxu0 %v3580_v26  ;;  %v3660_v18 = vcombine.high %v327_v7, %v331_v9  ;;  %v3659_v21 = vcombine.low %v327_v7, %v331_v9  ;;  %v188_v26 = vld [vmem:[#allocation6 + $0x1b0] sm:$0xff] }
  0xc0   :  { %1928 = vmatpush2.bf16.msra.mxu1 %v3715_v24  ;;  %v184_v24 = vld [vmem:[#allocation6 + $0x190] sm:$0xff] }
  0xc1   :  { %1929 = vmatprep.subr.bf16.mxu1 %v3708_v30  ;;  %v3525_v30 = vcombine.low %v192_v14, %v196_v16  ;;  %v140_v9 = vld [vmem:[#allocation6 + $0x30] sm:$0xff] }
  0xc2   :  { %1877 = vmatpush2.bf16.msra.mxu0 %v3579_v32  ;;  %v3653_v32 = vcombine.low %v320_v17, %v324_v19  ;;  %v260_v19 = vld [vmem:[#allocation6 + $0x3f0] sm:$0xff] }
  0xc3   :  { %1878 = vmatprep.subr.bf16.mxu0 %v3572_v36  ;;  %v180_v36 = vld [vmem:[#allocation6 + $0x170] sm:$0xff] }
  0xc4   :  { %1930 = vmatpush2.bf16.msra.mxu1 %v3707_v33  ;;  %v3518_v33 = vcombine.high %v184_v24, %v188_v26 }
  0xc5   :  { %1931 = vmatprep.subr.bf16.mxu1 %v3700_v40  ;;  %v3517_v40 = vcombine.low %v184_v24, %v188_v26 }
  0xc6   :  { %1879 = vmatpush2.bf16.msra.mxu0 %v3571_v42  ;;  %v3510_v42 = vcombine.high %v176_v31, %v180_v36 }
  0xc7   :  { %1880 = vmatprep.subr.bf16.mxu0 %v3564_v44  ;;  %v168_v44 = vld [vmem:[#allocation6 + $0x110] sm:$0xff] }
  0xc8   :  { %1932 = vmatpush2.bf16.msra.mxu1 %v3699_v43  ;;  %v3638_v43 = vcombine.high %v304_v38, %v308_v39 }
  0xc9   :  { %1933 = vmatprep.subr.bf16.mxu1 %v3692_v48  ;;  %v3502_v48 = vcombine.high %v168_v44, %v172_v45 }
  0xca   :  { %1881 = vmatpush2.bf16.msra.mxu0 %v3563_v50  ;;  %v160_v50 = vld [vmem:[#allocation6 + $0xd0] sm:$0xff] }
  0xcb   :  { %1882 = vmatprep.subr.bf16.mxu0 %v3556_v52  ;;  %v292_v52 = vld [vmem:[#allocation6 + $0x4f0] sm:$0xff] }
  0xcc   :  { %1934 = vmatpush2.bf16.msra.mxu1 %v3691_v51  ;;  %v164_v51 = vld [vmem:[#allocation6 + $0xf0] sm:$0xff] }
  0xcd   :  { %1935 = vmatprep.subr.bf16.mxu1 %v3684_v57  ;;  %v3494_v54 = vcombine.high %v160_v50, %v164_v51  ;;  %v152_v57 = vld [vmem:[#allocation6 + $0x90] sm:$0xff] }
  0xce   :  { %1883 = vmatpush2.bf16.msra.mxu0 %v3555_v60  ;;  %v4404_v60 = vld [vmem:[#allocation2 + $0x4] ss:$16 sps:$4 sm:$0xff]   ;;  %v3486_v56 = vcombine.high %v152_v57, %v156_v58 }
  0xcf   :  { %1884 = vmatprep.subr.bf16.mxu0 %v3548_v62  ;;  %v4407_v62 = vld [vmem:[#allocation2 + $0xc] ss:$16 sps:$4 sm:$0xff]  }
  0xd0   :  { %1936 = vmatpush2.bf16.msra.mxu1 %v3683_v61  ;;  %v280_v61 = vld [vmem:[#allocation6 + $0x490] sm:$0xff] }
  0xd1   :  { %1937 = vmatprep.subr.bf16.mxu1 %v3676_v59  ;;  %v144_v59 = vld [vmem:[#allocation6 + $0x50] sm:$0xff] }
  0xd2   :  { %1885 = vmatpush2.bf16.msra.mxu0 %v3547_v2  ;;  %v272_v2 = vld [vmem:[#allocation6 + $0x450] sm:$0xff]  ;;  %v3478_v6 = vcombine.high %v144_v59, %v148_v1 }
  0xd3   :  { %1886 = vmatprep.subr.bf16.mxu0 %v3540_v4  ;;  %v3485_v4 = vcombine.low %v152_v57, %v156_v58 }
  0xd4   :  { %1938 = vmatpush2.bf16.msra.mxu1 %v3675_v3  ;;  %v276_v3 = vld [vmem:[#allocation6 + $0x470] sm:$0xff] }
  0xd5   :  { %1939 = vmatprep.subr.bf16.mxu1 %v3668_v8  ;;  %v3606_v7 = vcombine.high %v272_v2, %v276_v3  ;;  %v136_v8 = vld [vmem:[#allocation6 + $0x10] sm:$0xff]  ;;  %v3605_v14 = vcombine.low %v272_v2, %v276_v3 }
  0xd6   :  { %1887 = vmatpush2.bf16.msra.mxu0 %v3539_v10  ;;  %v264_v10 = vld [vmem:[#allocation6 + $0x410] sm:$0xff]  ;;  %v3470_v16 = vcombine.high %v136_v8, %v140_v9 }
  0xd7   :  { %1888 = vmatprep.subr.bf16.mxu0 %v3532_v13  ;;  %v3477_v13 = vcombine.low %v144_v59, %v148_v1  ;;  %v208_v2 = vld [vmem:[#allocation6 + $0x250] sm:$0xff] }
  0xd8   :  { %1940 = vmatpush2.bf16.msra.mxu1 %v3667_v11  ;;  %v268_v11 = vld [vmem:[#allocation6 + $0x430] sm:$0xff] }
  0xd9   :  { %1941 = vmatprep.subr.bf16.mxu1 %v3660_v18  ;;  %v3598_v17 = vcombine.high %v264_v10, %v268_v11  ;;  %v256_v18 = vld [vmem:[#allocation6 + $0x3d0] sm:$0xff]  ;;  %v3597_v24 = vcombine.low %v264_v10, %v268_v11 }
  0xda   :  { %1889 = vmatpush2.bf16.msra.mxu0 %v3531_v20  ;;  %v384_v20 = vld [vmem:[#allocation6 + $0x7d0] sm:$0xff]  ;;  %v3590_v26 = vcombine.high %v256_v18, %v260_v19 }
  0xdb   :  { %1964 = vmatprep.subr.bf16.mxu0 %v3526_v23  ;;  %v3469_v23 = vcombine.low %v136_v8, %v140_v9  ;;  %v212_v3 = vld [vmem:[#allocation6 + $0x270] sm:$0xff] }
  0xdc   :  { %1942 = vmatpush2.bf16.msra.mxu1 %v3659_v21  ;;  %v388_v21 = vld [vmem:[#allocation6 + $0x7f0] sm:$0xff]  ;;  %v3542_v8 = vcombine.high %v208_v2, %v212_v3 }
  0xdd   :  { %2017 = vmatprep.subr.bf16.mxu1 %v3654_v28  ;;  %1891 = vmatmul.mubr.bf16.vlgmr.msra.gmra.mxu0 %v4378_v12  ;;  %v3509_v12 = vcombine.low %v176_v31, %v180_v36  ;;  %v3718_v27 = vcombine.high %v384_v20, %v388_v21  ;;  %v248_v28 = vld [vmem:[#allocation6 + $0x390] sm:$0xff] }
  0xde   :  { %1965 = vmatpush1.bf16.msra.mxu0 %v3525_v30  ;;  %1900 = vmatprep.mubr.bf16.mxu0 %v4382_v22  ;;  %v288_v22 = vld [vmem:[#allocation6 + $0x4d0] sm:$0xff]  ;;  %v3582_v36 = vcombine.high %v248_v28, %v252_v29 }
  0xdf   :  { %1944 = vmatmul.mubr.bf16.vlgmr.msra.gmra.mxu1 %v4380_v15  ;;  %1966 = vmatprep.subr.bf16.mxu0 %v3518_v33  ;;  %v3637_v15 = vcombine.low %v304_v38, %v308_v39  ;;  %v3622_v55 = vcombine.high %v288_v22, %v292_v52  ;;  %v3621_v63 = vcombine.low %v288_v22, %v292_v52  ;;  %v376_v30 = vld [vmem:[#allocation6 + $0x790] sm:$0xff] }
  0xe0   :  { %2018 = vmatpush1.bf16.msra.mxu1 %v3653_v32  ;;  %1953 = vmatprep.mubr.bf16.mxu1 %v4385_v25  ;;  %v3501_v25 = vcombine.low %v168_v44, %v172_v45  ;;  %v380_v31 = vld [vmem:[#allocation6 + $0x7b0] sm:$0xff]  ;;  %v3589_v32 = vcombine.low %v256_v18, %v260_v19  ;;  %v3717_v33 = vcombine.low %v384_v20, %v388_v21  ;;  %v193_v20 = vld [vmem:[#allocation6 + $0x1d8] sm:$0xff] }
  0xe1   :  { %2019 = vmatprep.subr.bf16.mxu1 %v3646_v37  ;;  %v3710_v37 = vcombine.high %v376_v30, %v380_v31  ;;  %v240_v38 = vld [vmem:[#allocation6 + $0x350] sm:$0xff]  ;;  %v197_v21 = vld [vmem:[#allocation6 + $0x1f8] sm:$0xff] }
  0xe2   :  { %1967 = vmatpush1.bf16.msra.mxu0 %v3517_v40  ;;  %v244_v39 = vld [vmem:[#allocation6 + $0x370] sm:$0xff] }
  0xe3   :  { %1968 = vmatprep.subr.bf16.mxu0 %v3510_v42  ;;  %v368_v40 = vld [vmem:[#allocation6 + $0x750] sm:$0xff]  ;;  %v3581_v42 = vcombine.low %v248_v28, %v252_v29  ;;  %v3574_v44 = vcombine.high %v240_v38, %v244_v39  ;;  %v3528_v28 = vcombine.high %v193_v20, %v197_v21 }
  0xe4   :  { %2020 = vmatpush1.bf16.msra.mxu1 %v3645_v41  ;;  %v372_v41 = vld [vmem:[#allocation6 + $0x770] sm:$0xff] }
  0xe5   :  { %2021 = vmatprep.subr.bf16.mxu1 %v3638_v43  ;;  %1901 = vmatmul.mubr.bf16.gmra.mxu0 %v4389_v34  ;;  %v284_v34 = vld [vmem:[#allocation6 + $0x4b0] sm:$0xff]  ;;  %v3709_v43 = vcombine.low %v376_v30, %v380_v31  ;;  %v3702_v45 = vcombine.high %v368_v40, %v372_v41  ;;  %v185_v30 = vld [vmem:[#allocation6 + $0x198] sm:$0xff] }
  0xe6   :  { %1969 = vmatpush1.bf16.msra.mxu0 %v3509_v12  ;;  %1996 = vmatprep.mubr.bf16.mxu0 %v4404_v60  ;;  %v3614_v0 = vcombine.high %v280_v61, %v284_v34  ;;  %v3613_v5 = vcombine.low %v280_v61, %v284_v34  ;;  %v360_v12 = vld [vmem:[#allocation6 + $0x710] sm:$0xff]  ;;  %v189_v31 = vld [vmem:[#allocation6 + $0x1b8] sm:$0xff] }
  0xe7   :  { %1954 = vmatmul.mubr.bf16.gmra.mxu1 %v4392_v35  ;;  %1970 = vmatprep.subr.bf16.mxu0 %v3502_v48  ;;  %v3493_v35 = vcombine.low %v160_v50, %v164_v51  ;;  %v3573_v48 = vcombine.low %v240_v38, %v244_v39  ;;  %v3566_v50 = vcombine.high %v232_v46, %v236_v47  ;;  %v224_v22 = vld [vmem:[#allocation6 + $0x2d0] sm:$0xff] }
  0xe8   :  { %2022 = vmatpush1.bf16.msra.mxu1 %v3637_v15  ;;  %2049 = vmatprep.mubr.bf16.mxu1 %v4407_v62  ;;  %v364_v15 = vld [vmem:[#allocation6 + $0x730] sm:$0xff]  ;;  %v3520_v38 = vcombine.high %v185_v30, %v189_v31 }
  0xe9   :  { %2023 = vmatprep.subr.bf16.mxu1 %v3630_v49  ;;  %v3701_v49 = vcombine.low %v368_v40, %v372_v41  ;;  %v3694_v51 = vcombine.high %v360_v12, %v364_v15  ;;  %v228_v52 = vld [vmem:[#allocation6 + $0x2f0] sm:$0xff]  ;;  %v177_v40 = vld [vmem:[#allocation6 + $0x158] sm:$0xff] }
  0xea   :  { %1971 = vmatpush1.bf16.msra.mxu0 %v3501_v25  ;;  %v352_v25 = vld [vmem:[#allocation6 + $0x6d0] sm:$0xff]  ;;  %v3558_v57 = vcombine.high %v224_v22, %v228_v52  ;;  %v181_v41 = vld [vmem:[#allocation6 + $0x178] sm:$0xff] }
  0xeb   :  { %1972 = vmatprep.subr.bf16.mxu0 %v3494_v54  ;;  %v3565_v54 = vcombine.low %v232_v46, %v236_v47  ;;  %v216_v61 = vld [vmem:[#allocation6 + $0x290] sm:$0xff]  ;;  %v3519_v46 = vcombine.low %v185_v30, %v189_v31  ;;  %v385_v30 = vld [vmem:[#allocation6 + $0x7d8] sm:$0xff] }
  0xec   :  { %2024 = vmatpush1.bf16.msra.mxu1 %v3629_v53  ;;  %v356_v53 = vld [vmem:[#allocation6 + $0x6f0] sm:$0xff]  ;;  %v389_v31 = vld [vmem:[#allocation6 + $0x7f8] sm:$0xff] }
  0xed   :  { %2025 = vmatprep.subr.bf16.mxu1 %v3622_v55  ;;  %v3693_v55 = vcombine.low %v360_v12, %v364_v15  ;;  %v3686_v58 = vcombine.high %v352_v25, %v356_v53  ;;  %v220_v34 = vld [vmem:[#allocation6 + $0x2b0] sm:$0xff]  ;;  %v3512_v12 = vcombine.high %v177_v40, %v181_v41 }
  0xee   :  { %1973 = vmatpush1.bf16.msra.mxu0 %v3493_v35  ;;  %v344_v35 = vld [vmem:[#allocation6 + $0x690] sm:$0xff]  ;;  %v3550_v59 = vcombine.high %v216_v61, %v220_v34 }
  0xef   :  { %1974 = vmatprep.subr.bf16.mxu0 %v3486_v56  ;;  %v3557_v56 = vcombine.low %v224_v22, %v228_v52  ;;  %v200_v10 = vld [vmem:[#allocation6 + $0x210] sm:$0xff]  ;;  %v297_v22 = vld [vmem:[#allocation6 + $0x518] sm:$0xff] }
  0xf0   :  { %2026 = vmatpush1.bf16.msra.mxu1 %v3621_v63  ;;  %v348_v63 = vld [vmem:[#allocation6 + $0x6b0] sm:$0xff]  ;;  %v301_v52 = vld [vmem:[#allocation6 + $0x538] sm:$0xff] }
  0xf1   :  { %2027 = vmatprep.subr.bf16.mxu1 %v3614_v0  ;;  %v3685_v0 = vcombine.low %v352_v25, %v356_v53  ;;  %v3678_v1 = vcombine.high %v344_v35, %v348_v63  ;;  %v204_v11 = vld [vmem:[#allocation6 + $0x230] sm:$0xff]  ;;  %v3511_v25 = vcombine.low %v177_v40, %v181_v41  ;;  %v377_v40 = vld [vmem:[#allocation6 + $0x798] sm:$0xff] }
  0xf2   :  { %1975 = vmatpush1.bf16.msra.mxu0 %v3485_v4  ;;  %v336_v4 = vld [vmem:[#allocation6 + $0x650] sm:$0xff]  ;;  %v3534_v18 = vcombine.high %v200_v10, %v204_v11  ;;  %v381_v41 = vld [vmem:[#allocation6 + $0x7b8] sm:$0xff] }
  0xf3   :  { %1976 = vmatprep.subr.bf16.mxu0 %v3478_v6  ;;  %v3549_v6 = vcombine.low %v216_v61, %v220_v34  ;;  %v4416_v15 = vld [vmem:[#allocation2 + $0x24] ss:$16 sps:$4 sm:$0xff]   ;;  %v4422_v61 = vld [vmem:[#allocation2 + $0x20] ss:$16 sps:$4 sm:$0xff]   ;;  %v289_v34 = vld [vmem:[#allocation6 + $0x4d8] sm:$0xff] }
  0xf4   :  { %2028 = vmatpush1.bf16.msra.mxu1 %v3613_v5  ;;  %v340_v5 = vld [vmem:[#allocation6 + $0x670] sm:$0xff] }
  0xf5   :  { %2029 = vmatprep.subr.bf16.mxu1 %v3606_v7  ;;  %v3677_v7 = vcombine.low %v344_v35, %v348_v63  ;;  %v3670_v9 = vcombine.high %v336_v4, %v340_v5  ;;  %v293_v35 = vld [vmem:[#allocation6 + $0x4f8] sm:$0xff] }
  0xf6   :  { %1977 = vmatpush1.bf16.msra.mxu0 %v3477_v13  ;;  %v328_v13 = vld [vmem:[#allocation6 + $0x610] sm:$0xff]  ;;  %v4425_v63 = vld [vmem:[#allocation2 + $0x28] ss:$16 sps:$4 sm:$0xff]  }
  0xf7   :  { %1978 = vmatprep.subr.bf16.mxu0 %v3470_v16  ;;  %v3541_v16 = vcombine.low %v208_v2, %v212_v3  ;;  %v153_v2 = vld [vmem:[#allocation6 + $0x98] sm:$0xff] }
  0xf8   :  { %2030 = vmatpush1.bf16.msra.mxu1 %v3605_v14  ;;  %v332_v14 = vld [vmem:[#allocation6 + $0x630] sm:$0xff]  ;;  %v157_v3 = vld [vmem:[#allocation6 + $0xb8] sm:$0xff] }
  0xf9   :  { %2031 = vmatprep.subr.bf16.mxu1 %v3598_v17  ;;  %v3669_v17 = vcombine.low %v336_v4, %v340_v5  ;;  %v3662_v19 = vcombine.high %v328_v13, %v332_v14  ;;  %v281_v4 = vld [vmem:[#allocation6 + $0x498] sm:$0xff] }
  0xfa   :  { %1979 = vmatpush1.bf16.msra.mxu0 %v3469_v23  ;;  %v321_v23 = vld [vmem:[#allocation6 + $0x5d8] sm:$0xff] }
  0xfb   :  { %1980 = vmatprep.subr.bf16.mxu0 %v3590_v26  ;;  %v3533_v26 = vcombine.low %v200_v10, %v204_v11  ;;  %v285_v5 = vld [vmem:[#allocation6 + $0x4b8] sm:$0xff] }
  0xfc   :  { %2032 = vmatpush1.bf16.msra.mxu1 %v3597_v24  ;;  %v325_v24 = vld [vmem:[#allocation6 + $0x5f8] sm:$0xff] }
  0xfd   :  { %2033 = vmatprep.subr.bf16.mxu1 %v3718_v27  ;;  %v3661_v27 = vcombine.low %v328_v13, %v332_v14  ;;  %v3656_v29 = vcombine.high %v321_v23, %v325_v24  ;;  %v145_v10 = vld [vmem:[#allocation6 + $0x58] sm:$0xff] }
  0xfe   :  { %1981 = vmatpush2.bf16.msra.mxu0 %v3589_v32  ;;  %v313_v32 = vld [vmem:[#allocation6 + $0x598] sm:$0xff] }
  0xff   :  { %1982 = vmatprep.subr.bf16.mxu0 %v3582_v36  ;;  %v3527_v36 = vcombine.low %v193_v20, %v197_v21  ;;  %v149_v11 = vld [vmem:[#allocation6 + $0x78] sm:$0xff] }
 0x100   :  { %2034 = vmatpush2.bf16.msra.mxu1 %v3717_v33  ;;  %v317_v33 = vld [vmem:[#allocation6 + $0x5b8] sm:$0xff] }
 0x101   :  { %2035 = vmatprep.subr.bf16.mxu1 %v3710_v37  ;;  %v3655_v37 = vcombine.low %v321_v23, %v325_v24  ;;  %v3648_v39 = vcombine.high %v313_v32, %v317_v33  ;;  %v3647_v47 = vcombine.low %v313_v32, %v317_v33  ;;  %v273_v13 = vld [vmem:[#allocation6 + $0x458] sm:$0xff]  ;;  %v3479_v23 = vcombine.low %v145_v10, %v149_v11 }
 0x102   :  { %1983 = vmatpush2.bf16.msra.mxu0 %v3581_v42  ;;  %v4410_v42 = vld [vmem:[#allocation2] ss:$16 sps:$4 sm:$0xff]   ;;  %v277_v14 = vld [vmem:[#allocation6 + $0x478] sm:$0xff] }
 0x103   :  { %1984 = vmatprep.subr.bf16.mxu0 %v3574_v44  ;;  %v309_v44 = vld [vmem:[#allocation6 + $0x578] sm:$0xff]  ;;  %v3607_v24 = vcombine.low %v273_v13, %v277_v14 }
 0x104   :  { %2036 = vmatpush2.bf16.msra.mxu1 %v3709_v43  ;;  %v305_v43 = vld [vmem:[#allocation6 + $0x558] sm:$0xff] }
 0x105   :  { %2037 = vmatprep.subr.bf16.mxu1 %v3702_v45  ;;  %v4413_v45 = vld [vmem:[#allocation2 + $0x8] ss:$16 sps:$4 sm:$0xff]   ;;  %v3639_v53 = vcombine.low %v305_v43, %v309_v44 }
 0x106   :  { %1985 = vmatpush2.bf16.msra.mxu0 %v3573_v48  ;;  %v3640_v48 = vcombine.high %v305_v43, %v309_v44  ;;  %v265_v20 = vld [vmem:[#allocation6 + $0x418] sm:$0xff]  ;;  %v3719_v44 = vcombine.low %v385_v30, %v389_v31 }
 0x107   :  { %1986 = vmatprep.subr.bf16.mxu0 %v3566_v50  ;;  %v173_v50 = vld [vmem:[#allocation6 + $0x138] sm:$0xff] }
 0x108   :  { %2038 = vmatpush2.bf16.msra.mxu1 %v3701_v49  ;;  %v169_v49 = vld [vmem:[#allocation6 + $0x118] sm:$0xff] }
 0x109   :  { %2039 = vmatprep.subr.bf16.mxu1 %v3694_v51  ;;  %v4419_v51 = vld [vmem:[#allocation2 + $0x2c] ss:$16 sps:$4 sm:$0xff]  }
 0x10a   :  { %1987 = vmatpush2.bf16.msra.mxu0 %v3565_v54  ;;  %v3504_v54 = vcombine.high %v169_v49, %v173_v50  ;;  %v269_v21 = vld [vmem:[#allocation6 + $0x438] sm:$0xff] }
 0x10b   :  { %1988 = vmatprep.subr.bf16.mxu0 %v3558_v57  ;;  %v161_v57 = vld [vmem:[#allocation6 + $0xd8] sm:$0xff]  ;;  %v3599_v33 = vcombine.low %v265_v20, %v269_v21 }
 0x10c   :  { %2040 = vmatpush2.bf16.msra.mxu1 %v3693_v55  ;;  %v3632_v55 = vcombine.high %v297_v22, %v301_v52 }
 0x10d   :  { %2041 = vmatprep.subr.bf16.mxu1 %v3686_v58  ;;  %v165_v58 = vld [vmem:[#allocation6 + $0xf8] sm:$0xff] }
 0x10e   :  { %1989 = vmatpush2.bf16.msra.mxu0 %v3557_v56  ;;  %v3503_v56 = vcombine.low %v169_v49, %v173_v50  ;;  %v369_v49 = vld [vmem:[#allocation6 + $0x758] sm:$0xff] }
 0x10f   :  { %1990 = vmatprep.subr.bf16.mxu0 %v3550_v59  ;;  %v3496_v59 = vcombine.high %v161_v57, %v165_v58  ;;  %v373_v50 = vld [vmem:[#allocation6 + $0x778] sm:$0xff] }
 0x110   :  { %2042 = vmatpush2.bf16.msra.mxu1 %v3685_v0  ;;  %v3631_v0 = vcombine.low %v297_v22, %v301_v52  ;;  %v3711_v52 = vcombine.low %v377_v40, %v381_v41 }
 0x111   :  { %2043 = vmatprep.subr.bf16.mxu1 %v3678_v1  ;;  %v3624_v1 = vcombine.high %v289_v34, %v293_v35 }
 0x112   :  { %1991 = vmatpush2.bf16.msra.mxu0 %v3549_v6  ;;  %v3495_v6 = vcombine.low %v161_v57, %v165_v58  ;;  %v361_v57 = vld [vmem:[#allocation6 + $0x718] sm:$0xff] }
 0x113   :  { %1992 = vmatprep.subr.bf16.mxu0 %v3542_v8  ;;  %v3488_v8 = vcombine.high %v153_v2, %v157_v3  ;;  %v365_v58 = vld [vmem:[#allocation6 + $0x738] sm:$0xff] }
 0x114   :  { %2044 = vmatpush2.bf16.msra.mxu1 %v3677_v7  ;;  %v3623_v7 = vcombine.low %v289_v34, %v293_v35  ;;  %v3703_v35 = vcombine.low %v369_v49, %v373_v50 }
 0x115   :  { %2045 = vmatprep.subr.bf16.mxu1 %v3670_v9  ;;  %v3616_v9 = vcombine.high %v281_v4, %v285_v5 }
 0x116   :  { %1993 = vmatpush2.bf16.msra.mxu0 %v3541_v16  ;;  %v3487_v16 = vcombine.low %v153_v2, %v157_v3  ;;  %v353_v2 = vld [vmem:[#allocation6 + $0x6d8] sm:$0xff] }
 0x117   :  { %1994 = vmatprep.subr.bf16.mxu0 %v3534_v18  ;;  %v137_v18 = vld [vmem:[#allocation6 + $0x18] sm:$0xff] }
 0x118   :  { %2046 = vmatpush2.bf16.msra.mxu1 %v3669_v17  ;;  %v3480_v17 = vcombine.high %v145_v10, %v149_v11  ;;  %v357_v3 = vld [vmem:[#allocation6 + $0x6f8] sm:$0xff] }
 0x119   :  { %2047 = vmatprep.subr.bf16.mxu1 %v3662_v19  ;;  %v141_v19 = vld [vmem:[#allocation6 + $0x38] sm:$0xff] }
 0x11a   :  { %1995 = vmatpush2.bf16.msra.mxu0 %v3533_v26  ;;  %v3472_v26 = vcombine.high %v137_v18, %v141_v19  ;;  %v3471_v32 = vcombine.low %v137_v18, %v141_v19  ;;  %v345_v10 = vld [vmem:[#allocation6 + $0x698] sm:$0xff] }
 0x11b   :  { %2070 = vmatprep.subr.bf16.mxu0 %v3528_v28  ;;  %v257_v28 = vld [vmem:[#allocation6 + $0x3d8] sm:$0xff] }
 0x11c   :  { %2048 = vmatpush2.bf16.msra.mxu1 %v3661_v27  ;;  %v3600_v27 = vcombine.high %v265_v20, %v269_v21  ;;  %v349_v11 = vld [vmem:[#allocation6 + $0x6b8] sm:$0xff] }
 0x11d   :  { %2123 = vmatprep.subr.bf16.mxu1 %v3656_v29  ;;  %1997 = vmatmul.mubr.bf16.vlgmr.msra.gmra.mxu0 %v4410_v42  ;;  %v261_v29 = vld [vmem:[#allocation6 + $0x3f8] sm:$0xff]  ;;  %v3679_v21 = vcombine.low %v345_v10, %v349_v11 }
 0x11e   :  { %2071 = vmatpush1.bf16.msra.mxu0 %v3527_v36  ;;  %2006 = vmatprep.mubr.bf16.mxu0 %v4416_v15  ;;  %v3592_v36 = vcombine.high %v257_v28, %v261_v29  ;;  %v3591_v43 = vcombine.low %v257_v28, %v261_v29  ;;  %v337_v18 = vld [vmem:[#allocation6 + $0x658] sm:$0xff]  ;;  %v392_v28 = vlaneseq }
 0x11f   :  { %2050 = vmatmul.mubr.bf16.vlgmr.msra.gmra.mxu1 %v4413_v45  ;;  %2072 = vmatprep.subr.bf16.mxu0 %v3520_v38  ;;  %v249_v38 = vld [vmem:[#allocation6 + $0x398] sm:$0xff] }
 0x120   :  { %2124 = vmatpush1.bf16.msra.mxu1 %v3655_v37  ;;  %2059 = vmatprep.mubr.bf16.mxu1 %v4419_v51  ;;  %v3720_v37 = vcombine.high %v385_v30, %v389_v31  ;;  %v341_v19 = vld [vmem:[#allocation6 + $0x678] sm:$0xff] }
 0x121   :  { %2125 = vmatprep.subr.bf16.mxu1 %v3648_v39  ;;  %v253_v39 = vld [vmem:[#allocation6 + $0x3b8] sm:$0xff] }
 0x122   :  { %2073 = vmatpush1.bf16.msra.mxu0 %v3519_v46  ;;  %v3584_v46 = vcombine.high %v249_v38, %v253_v39  ;;  %v3583_v22 = vcombine.low %v249_v38, %v253_v39  ;;  %v329_v29 = vld [vmem:[#allocation6 + $0x618] sm:$0xff] }
 0x123   :  { %2074 = vmatprep.subr.bf16.mxu0 %v3512_v12  ;;  %v241_v12 = vld [vmem:[#allocation6 + $0x358] sm:$0xff] }
 0x124   :  { %2126 = vmatpush1.bf16.msra.mxu1 %v3647_v47  ;;  %v3712_v47 = vcombine.high %v377_v40, %v381_v41  ;;  %v333_v30 = vld [vmem:[#allocation6 + $0x638] sm:$0xff] }
 0x125   :  { %2127 = vmatprep.subr.bf16.mxu1 %v3640_v48  ;;  %2007 = vmatmul.mubr.bf16.gmra.mxu0 %v4422_v61  ;;  %v245_v48 = vld [vmem:[#allocation6 + $0x378] sm:$0xff]  ;;  %v3663_v39 = vcombine.low %v329_v29, %v333_v30 }
 0x126   :  { %2075 = vmatpush1.bf16.msra.mxu0 %v3511_v25  ;;  %2102 = vmatprep.mubr.bf16.mxu0 %v4404_v60  ;;  %v3615_v60 = vcombine.low %v281_v4, %v285_v5  ;;  %v3576_v25 = vcombine.high %v241_v12, %v245_v48  ;;  %v3575_v34 = vcombine.low %v241_v12, %v245_v48  ;;  %v3880_v40 = vld [vmem:[#allocation9 + $0x74] ss:$8 sps:$4 sm:$0xff]   ;;  %v3893_v48 = vld [vmem:[#allocation9 + $0x170] ss:$8 sps:$4 sm:$0xff]  }
 0x127   :  { %2060 = vmatmul.mubr.bf16.gmra.mxu1 %v4425_v63  ;;  %2076 = vmatprep.subr.bf16.mxu0 %v3504_v54  ;;  %v233_v54 = vld [vmem:[#allocation6 + $0x318] sm:$0xff]  ;;  %v3695_v5 = vcombine.low %v361_v57, %v365_v58 }
 0x128   :  { %2128 = vmatpush1.bf16.msra.mxu1 %v3639_v53  ;;  %2155 = vmatprep.mubr.bf16.mxu1 %v4407_v62  ;;  %v3608_v62 = vcombine.high %v273_v13, %v277_v14  ;;  %v3704_v53 = vcombine.high %v369_v49, %v373_v50  ;;  %v3687_v14 = vcombine.low %v353_v2, %v357_v3  ;;  %v3901_v50 = vld [vmem:[#allocation9 + $0x164] ss:$8 sps:$4 sm:$0xff]  }
 0x129   :  { %2129 = vmatprep.subr.bf16.mxu1 %v3632_v55  ;;  %v237_v55 = vld [vmem:[#allocation6 + $0x338] sm:$0xff] }
 0x12a   :  { %2077 = vmatpush1.bf16.msra.mxu0 %v3503_v56  ;;  %v3568_v56 = vcombine.high %v233_v54, %v237_v55  ;;  %v3567_v4 = vcombine.low %v233_v54, %v237_v55 }
 0x12b   :  { %2078 = vmatprep.subr.bf16.mxu0 %v3496_v59  ;;  %v225_v59 = vld [vmem:[#allocation6 + $0x2d8] sm:$0xff] }
 0x12c   :  { %2130 = vmatpush1.bf16.msra.mxu1 %v3631_v0  ;;  %v3696_v0 = vcombine.high %v361_v57, %v365_v58  ;;  %v3899_v57 = vld [vmem:[#allocation9 + $0x160] ss:$8 sps:$4 sm:$0xff]   ;;  %v3907_v58 = vld [vmem:[#allocation9 + $0x154] ss:$8 sps:$4 sm:$0xff]  }
 0x12d   :  { %2131 = vmatprep.subr.bf16.mxu1 %v3624_v1  ;;  %v229_v1 = vld [vmem:[#allocation6 + $0x2f8] sm:$0xff] }
 0x12e   :  { %2079 = vmatpush1.bf16.msra.mxu0 %v3495_v6  ;;  %v3560_v6 = vcombine.high %v225_v59, %v229_v1  ;;  %v3559_v13 = vcombine.low %v225_v59, %v229_v1  ;;  %v3905_v59 = vld [vmem:[#allocation9 + $0x150] ss:$8 sps:$4 sm:$0xff]  }
 0x12f   :  { %2080 = vmatprep.subr.bf16.mxu0 %v3488_v8  ;;  %v217_v8 = vld [vmem:[#allocation6 + $0x298] sm:$0xff] }
 0x130   :  { %2132 = vmatpush1.bf16.msra.mxu1 %v3623_v7  ;;  %v3688_v7 = vcombine.high %v353_v2, %v357_v3  ;;  %v3887_v3 = vld [vmem:[#allocation9 + $0x40] ss:$8 sps:$4 sm:$0xff]  }
 0x131   :  { %2133 = vmatprep.subr.bf16.mxu1 %v3616_v9  ;;  %v221_v9 = vld [vmem:[#allocation6 + $0x2b8] sm:$0xff] }
 0x132   :  { %2081 = vmatpush1.bf16.msra.mxu0 %v3487_v16  ;;  %v3552_v16 = vcombine.high %v217_v8, %v221_v9  ;;  %v3551_v20 = vcombine.low %v217_v8, %v221_v9  ;;  %v3919_v8 = vld [vmem:[#allocation9 + $0x134] ss:$8 sps:$4 sm:$0xff]  }
 0x133   :  { %2082 = vmatprep.subr.bf16.mxu0 %v3480_v17  ;;  %v209_v17 = vld [vmem:[#allocation6 + $0x258] sm:$0xff] }
 0x134   :  { %2134 = vmatpush1.bf16.msra.mxu1 %v3615_v60  ;;  %v3680_v60 = vcombine.high %v345_v10, %v349_v11  ;;  %v3890_v10 = vld [vmem:[#allocation9 + $0x30] ss:$8 sps:$4 sm:$0xff]  }
 0x135   :  { %2135 = vmatprep.subr.bf16.mxu1 %v3608_v62  ;;  %v213_v62 = vld [vmem:[#allocation6 + $0x278] sm:$0xff] }
 0x136   :  { %2083 = vmatpush1.bf16.msra.mxu0 %v3479_v23  ;;  %v3544_v23 = vcombine.high %v209_v17, %v213_v62  ;;  %v3543_v31 = vcombine.low %v209_v17, %v213_v62  ;;  %v3917_v11 = vld [vmem:[#allocation9 + $0x130] ss:$8 sps:$4 sm:$0xff]   ;;  %v3910_v62 = vld [vmem:[#allocation9 + $0x4] ss:$8 sps:$4 sm:$0xff]  }
 0x137   :  { %2084 = vmatprep.subr.bf16.mxu0 %v3472_v26  ;;  %v201_v26 = vld [vmem:[#allocation6 + $0x218] sm:$0xff] }
 0x138   :  { %2136 = vmatpush1.bf16.msra.mxu1 %v3607_v24  ;;  %v3672_v24 = vcombine.high %v337_v18, %v341_v19  ;;  %v3902_v17 = vld [vmem:[#allocation9 + $0x10] ss:$8 sps:$4 sm:$0xff]  }
 0x139   :  { %2137 = vmatprep.subr.bf16.mxu1 %v3600_v27  ;;  %v205_v27 = vld [vmem:[#allocation6 + $0x238] sm:$0xff] }
 0x13a   :  { %2085 = vmatpush1.bf16.msra.mxu0 %v3471_v32  ;;  %v3671_v32 = vcombine.low %v337_v18, %v341_v19  ;;  %v3535_v38 = vcombine.low %v201_v26, %v205_v27  ;;  %v3929_v18 = vld [vmem:[#allocation9 + $0x110] ss:$8 sps:$4 sm:$0xff]   ;;  %v3937_v19 = vld [vmem:[#allocation9 + $0x104] ss:$8 sps:$4 sm:$0xff]  }
 0x13b   :  { %2086 = vmatprep.subr.bf16.mxu0 %v3592_v36  ;;  %v3664_v36 = vcombine.high %v329_v29, %v333_v30  ;;  %v3949_v29 = vld [vmem:[#allocation9 + $0x1e4] ss:$8 sps:$4 sm:$0xff]   ;;  %v3920_v30 = vld [vmem:[#allocation9 + $0xe0] ss:$8 sps:$4 sm:$0xff]  }
 0x13c   :  { %2138 = vmatpush1.bf16.msra.mxu1 %v3599_v33  ;;  %v3536_v33 = vcombine.high %v201_v26, %v205_v27  ;;  %v3914_v26 = vld [vmem:[#allocation9 + $0xf0] ss:$8 sps:$4 sm:$0xff]   ;;  %v3922_v27 = vld [vmem:[#allocation9 + $0xe4] ss:$8 sps:$4 sm:$0xff]  }
 0x13d   :  { %2139 = vmatprep.subr.bf16.mxu1 %v3720_v37  ;;  %v4430_v37 = vshrl.u32 %v392_v28, 7  ;;  %v3941_v28 = vld [vmem:[#allocation9 + $0x1f0] ss:$8 sps:$4 sm:$0xff]  }
 0x13e   :  { %2087 = vmatpush2.bf16.msra.mxu0 %v3591_v43  ;;  %v3895_v43 = vld [vmem:[#allocation9 + $0x174] ss:$8 sps:$4 sm:$0xff]  }
 0x13f   :  { %2088 = vmatprep.subr.bf16.mxu0 %v3584_v46  ;;  %v398_v41 = vsub.s32 1, %v4430_v37  ;;  %v3878_v46 = vld [vmem:[#allocation9 + $0x70] ss:$8 sps:$4 sm:$0xff]  }
 0x140   :  { %2140 = vmatpush2.bf16.msra.mxu1 %v3719_v44  ;;  %v4433_v44 = vld [vmem:[#allocation8] sm:$0xff] }
 0x141   :  { %2141 = vmatprep.subr.bf16.mxu1 %v3712_v47  ;;  %v3883_v47 = vld [vmem:[#allocation9 + $0x64] ss:$8 sps:$4 sm:$0xff]   ;;  %v4438_v12 = vrot.slane %v4433_v44, %v398_v41 }
 0x142   :  { %2089 = vmatpush2.bf16.msra.mxu0 %v3583_v22 }
 0x143   :  { %2090 = vmatprep.subr.bf16.mxu0 %v3576_v25 }
 0x144   :  { %2142 = vmatpush2.bf16.msra.mxu1 %v3711_v52  ;;  %v3881_v52 = vld [vmem:[#allocation9 + $0x60] ss:$8 sps:$4 sm:$0xff]  }
 0x145   :  { %2143 = vmatprep.subr.bf16.mxu1 %v3704_v53  ;;  %v3886_v53 = vld [vmem:[#allocation9 + $0x54] ss:$8 sps:$4 sm:$0xff]  }
 0x146   :  { %2091 = vmatpush2.bf16.msra.mxu0 %v3575_v34 }
 0x147   :  { %2092 = vmatprep.subr.bf16.mxu0 %v3568_v56  ;;  %v3889_v56 = vld [vmem:[#allocation9 + $0x44] ss:$8 sps:$4 sm:$0xff]  }
 0x148   :  { %2144 = vmatpush2.bf16.msra.mxu1 %v3703_v35 }
 0x149   :  { %2145 = vmatprep.subr.bf16.mxu1 %v3696_v0 }
 0x14a   :  { %2093 = vmatpush2.bf16.msra.mxu0 %v3567_v4  ;;  %v3892_v4 = vld [vmem:[#allocation9 + $0x34] ss:$8 sps:$4 sm:$0xff]  }
 0x14b   :  { %2094 = vmatprep.subr.bf16.mxu0 %v3560_v6 }
 0x14c   :  { %2146 = vmatpush2.bf16.msra.mxu1 %v3695_v5 }
 0x14d   :  { %2147 = vmatprep.subr.bf16.mxu1 %v3688_v7  ;;  %v3911_v7 = vld [vmem:[#allocation9 + $0x140] ss:$8 sps:$4 sm:$0xff]  }
 0x14e   :  { %2095 = vmatpush2.bf16.msra.mxu0 %v3559_v13  ;;  %v3896_v13 = vld [vmem:[#allocation9 + $0x20] ss:$8 sps:$4 sm:$0xff]  }
 0x14f   :  { %2096 = vmatprep.subr.bf16.mxu0 %v3552_v16  ;;  %v3923_v16 = vld [vmem:[#allocation9 + $0x120] ss:$8 sps:$4 sm:$0xff]  }
 0x150   :  { %2148 = vmatpush2.bf16.msra.mxu1 %v3687_v14  ;;  %v3904_v14 = vld [vmem:[#allocation9 + $0x14] ss:$8 sps:$4 sm:$0xff]  }
 0x151   :  { %2149 = vmatprep.subr.bf16.mxu1 %v3680_v60  ;;  %v3931_v60 = vld [vmem:[#allocation9 + $0x114] ss:$8 sps:$4 sm:$0xff]  }
 0x152   :  { %2097 = vmatpush2.bf16.msra.mxu0 %v3551_v20  ;;  %v3908_v20 = vld [vmem:[#allocation9] ss:$8 sps:$4 sm:$0xff]  }
 0x153   :  { %2098 = vmatprep.subr.bf16.mxu0 %v3544_v23  ;;  %v3935_v23 = vld [vmem:[#allocation9 + $0x100] ss:$8 sps:$4 sm:$0xff]  }
 0x154   :  { %2150 = vmatpush2.bf16.msra.mxu1 %v3679_v21  ;;  %v3916_v21 = vld [vmem:[#allocation9 + $0xf4] ss:$8 sps:$4 sm:$0xff]  }
 0x155   :  { %2151 = vmatprep.subr.bf16.mxu1 %v3672_v24  ;;  %v3943_v24 = vld [vmem:[#allocation9 + $0x1f4] ss:$8 sps:$4 sm:$0xff]  }
 0x156   :  { %2099 = vmatpush2.bf16.msra.mxu0 %v3543_v31  ;;  %v3928_v31 = vld [vmem:[#allocation9 + $0xd4] ss:$8 sps:$4 sm:$0xff]  }
 0x157   :  { %2100 = vmatprep.subr.bf16.mxu0 %v3536_v33  ;;  %v3947_v33 = vld [vmem:[#allocation9 + $0x1e0] ss:$8 sps:$4 sm:$0xff]  }
 0x158   :  { %2152 = vmatpush2.bf16.msra.mxu1 %v3671_v32 }
 0x159   :  { %2153 = vmatprep.subr.bf16.mxu1 %v3664_v36  ;;  %v3955_v36 = vld [vmem:[#allocation9 + $0x1d4] ss:$8 sps:$4 sm:$0xff]  }
 0x15a   :  { %2101 = vmatpush2.bf16.msra.mxu0 %v3535_v38  ;;  %v3926_v38 = vld [vmem:[#allocation9 + $0xd0] ss:$8 sps:$4 sm:$0xff]  }
 0x15b   :  { %3004 = vmatprep.subr.bf16.mxu0 %v3880_v40 }
 0x15c   :  { %2154 = vmatpush2.bf16.msra.mxu1 %v3663_v39  ;;  %v3934_v39 = vld [vmem:[#allocation9 + $0xc4] ss:$8 sps:$4 sm:$0xff]  }
 0x15d   :  { %3057 = vmatprep.subr.bf16.mxu1 %v3895_v43  ;;  %v4440_v49 = vpop.f32.mrf.mxu0  ;;  %2103 = vmatmul.mubr.bf16.vlgmr.msra.gmra.mxu0 %v4410_v42 }
 0x15e   :  { %3005 = vmatpush1.bf16.msra.mxu0 %v3878_v46  ;;  %2112 = vmatprep.mubr.bf16.mxu0 %v4416_v15  ;;  %v3953_v46 = vld [vmem:[#allocation9 + $0x1d0] ss:$8 sps:$4 sm:$0xff]  }
 0x15f   :  { %v4443_v22 = vpop.f32.mrf.mxu1  ;;  %2156 = vmatmul.mubr.bf16.vlgmr.msra.gmra.mxu1 %v4413_v45  ;;  %v1788_v25 = vpop.f32.mrf.mxu0  ;;  %3006 = vmatprep.subr.bf16.mxu0 %v3883_v47  ;;  %v3884_v45 = vld [vmem:[#allocation9 + $0x50] ss:$8 sps:$4 sm:$0xff]   ;;  %v3961_v47 = vld [vmem:[#allocation9 + $0x1c4] ss:$8 sps:$4 sm:$0xff]  }
 0x160   :  { %v1789_v54 = vadd.f32 %v1788_v25, %v4438_v12  ;;  %2165 = vmatprep.mubr.bf16.mxu1 %v4419_v51  ;;  %3058 = vmatpush1.bf16.msra.mxu1 %v3893_v48  ;;  %v3913_v51 = vld [vmem:[#allocation9 + $0x144] ss:$8 sps:$4 sm:$0xff]   ;;  %v3932_v48 = vld [vmem:[#allocation9 + $0xc0] ss:$8 sps:$4 sm:$0xff]  }
 0x161   :  { %v1841_v55 = vpop.f32.mrf.mxu1  ;;  %v4449_v42 = vpop.f32.mrf.mxu0  ;;  %3059 = vmatprep.subr.bf16.mxu1 %v3901_v50  ;;  %v3940_v50 = vld [vmem:[#allocation9 + $0xb4] ss:$8 sps:$4 sm:$0xff]  }
 0x162   :  { %3007 = vmatpush1.bf16.msra.mxu0 %v3881_v52  ;;  %v1842_v15 = vadd.f32 %v1841_v55, %v1789_v54  ;;  %v394_v54 = vsub.s32 0, %v4430_v37  ;;  %v3964_v55 = vld [vmem:[#allocation9 + $0x1b4] ss:$8 sps:$4 sm:$0xff]  }
 0x163   :  { %v4451_v34 = vpop.f32.mrf.mxu1  ;;  %v1792_v35 = vpop.f32.mrf.mxu0  ;;  %3008 = vmatprep.subr.bf16.mxu0 %v3886_v53  ;;  %v3959_v53 = vld [vmem:[#allocation9 + $0x1c0] ss:$8 sps:$4 sm:$0xff]  }
 0x164   :  { %v1793_v0 = vadd.f32 %v1792_v35, %v4438_v12  ;;  %3060 = vmatpush1.bf16.msra.mxu1 %v3899_v57  ;;  %v2177_v5 = vmax.f32 %v1842_v15, 0.0  ;;  %v3938_v57 = vld [vmem:[#allocation9 + $0xb0] ss:$8 sps:$4 sm:$0xff]   ;;  %v395_v15 = vrot.slane %v4433_v44, %v394_v54 }
 0x165   :  { %v1845_v1 = vpop.f32.mrf.mxu1  ;;  %2113 = vmatmul.mubr.bf16.gmra.mxu0 %v4422_v61  ;;  %3061 = vmatprep.subr.bf16.mxu1 %v3907_v58  ;;  %v3898_v61 = vld [vmem:[#allocation9 + $0x24] ss:$8 sps:$4 sm:$0xff]   ;;  %v4456_v32 = vpop.f32.mrf.mxu0 }
 0x166   :  { %v1846_v2 = vadd.f32 %v1845_v1, %v1793_v0  ;;  %3009 = vmatpush1.bf16.msra.mxu0 %v3884_v45  ;;  %v3946_v58 = vld [vmem:[#allocation9 + $0xa4] ss:$8 sps:$4 sm:$0xff]  }
 0x167   :  { %2166 = vmatmul.mubr.bf16.gmra.mxu1 %v4425_v63  ;;  %3010 = vmatprep.subr.bf16.mxu0 %v3889_v56  ;;  %v3925_v63 = vld [vmem:[#allocation9 + $0x124] ss:$8 sps:$4 sm:$0xff]   ;;  %v1798_v40 = vpop.f32.mrf.mxu0  ;;  %v4458_v43 = vpop.f32.mrf.mxu1  ;;  %v3962_v56 = vld [vmem:[#allocation9 + $0x1b0] ss:$8 sps:$4 sm:$0xff]  }
 0x168   :  { %v2185_v6 = vmax.f32 %v1846_v2, 0.0  ;;  %3062 = vmatpush1.bf16.msra.mxu1 %v3905_v59  ;;  %v3967_v0 = vld [vmem:[#allocation9 + $0x1a4] ss:$8 sps:$4 sm:$0xff]   ;;  %v3944_v59 = vld [vmem:[#allocation9 + $0xa0] ss:$8 sps:$4 sm:$0xff]   ;;  %v1799_v1 = vadd.f32 %v1798_v40, %v4438_v12  ;;  %v1791_v2 = vadd.f32 %v4449_v42, %v395_v15 }
 0x169   :  { %3063 = vmatprep.subr.bf16.mxu1 %v3913_v51  ;;  %v1800_v52 = vpop.f32.mrf.mxu0  ;;  %v1851_v25 = vpop.f32.mrf.mxu1  ;;  %v3982_v40 = vld [vmem:[#allocation9 + $0x254] ss:$8 sps:$4 sm:$0xff]  }
 0x16a   :  { %v2209_v9 = vpack.c.bf16 %v2185_v6, %v2177_v5  ;;  %3011 = vmatpush1.bf16.msra.mxu0 %v3887_v3  ;;  %v3952_v3 = vld [vmem:[#allocation9 + $0x94] ss:$8 sps:$4 sm:$0xff]   ;;  %v3965_v5 = vld [vmem:[#allocation9 + $0x1a0] ss:$8 sps:$4 sm:$0xff]   ;;  %v1787_v6 = vadd.f32 %v4440_v49, %v395_v15 }
 0x16b   :  { %3012 = vmatprep.subr.bf16.mxu0 %v3892_v4  ;;  %v1802_v45 = vpop.f32.mrf.mxu0  ;;  %v1853_v35 = vpop.f32.mrf.mxu1  ;;  %v3956_v49 = vld [vmem:[#allocation9 + $0x80] ss:$8 sps:$4 sm:$0xff]  }
 0x16c   :  { %3036 = vmatprep.mubr.bf16.mxu0 %v2209_v9  ;;  %3064 = vmatpush1.bf16.msra.mxu1 %v3911_v7  ;;  %v1803_v51 = vadd.f32 %v1802_v45, %v4438_v12  ;;  %v3970_v7 = vld [vmem:[#allocation9 + $0x194] ss:$8 sps:$4 sm:$0xff]   ;;  %v3950_v9 = vld [vmem:[#allocation9 + $0x90] ss:$8 sps:$4 sm:$0xff]   ;;  %v1840_v42 = vadd.f32 %v4443_v22, %v1787_v6 }
 0x16d   :  { %3065 = vmatprep.subr.bf16.mxu1 %v3919_v8  ;;  %v1855_v4 = vpop.f32.mrf.mxu1  ;;  %v1852_v8 = vadd.f32 %v1851_v25, %v1799_v1  ;;  %v3968_v12 = vld [vmem:[#allocation9 + $0x190] ss:$8 sps:$4 sm:$0xff]   ;;  %v4024_v22 = vld [vmem:[#allocation9 + $0x374] ss:$8 sps:$4 sm:$0xff]  }
 0x16e   :  { %3013 = vmatpush1.bf16.msra.mxu0 %v3890_v10  ;;  %v1856_v10 = vadd.f32 %v1855_v4, %v1803_v51  ;;  %v3980_v25 = vld [vmem:[#allocation9 + $0x250] ss:$8 sps:$4 sm:$0xff]  }
 0x16f   :  { %3014 = vmatprep.subr.bf16.mxu0 %v3898_v61  ;;  %v1844_v61 = vadd.f32 %v4451_v34, %v1791_v2  ;;  %v406_v34 = vsub.s32 3, %v4430_v37  ;;  %v3983_v2 = vld [vmem:[#allocation9 + $0x240] ss:$8 sps:$4 sm:$0xff]  }
 0x170   :  { %3066 = vmatpush1.bf16.msra.mxu1 %v3917_v11  ;;  %v3958_v11 = vld [vmem:[#allocation9 + $0x84] ss:$8 sps:$4 sm:$0xff]  }
 0x171   :  { %3067 = vmatprep.subr.bf16.mxu1 %v3925_v63  ;;  %v3973_v63 = vld [vmem:[#allocation9 + $0x184] ss:$8 sps:$4 sm:$0xff]  }
 0x172   :  { %3015 = vmatpush1.bf16.msra.mxu0 %v3896_v13  ;;  %v2193_v13 = vmax.f32 %v1852_v8, 0.0 }
 0x173   :  { %3016 = vmatprep.subr.bf16.mxu0 %v3904_v14  ;;  %v2201_v14 = vmax.f32 %v1856_v10, 0.0 }
 0x174   :  { %3068 = vmatpush1.bf16.msra.mxu1 %v3923_v16  ;;  %v2184_v16 = vmax.f32 %v1844_v61, 0.0 }
 0x175   :  { %3069 = vmatprep.subr.bf16.mxu1 %v3931_v60  ;;  %v1797_v60 = vadd.f32 %v4456_v32, %v395_v15 }
 0x176   :  { %3017 = vmatpush1.bf16.msra.mxu0 %v3902_v17  ;;  %v1801_v17 = vadd.f32 %v1800_v52, %v395_v15 }
 0x177   :  { %3018 = vmatprep.subr.bf16.mxu0 %v3910_v62  ;;  %v3976_v62 = vld [vmem:[#allocation9 + $0x274] ss:$8 sps:$4 sm:$0xff]  }
 0x178   :  { %3070 = vmatpush1.bf16.msra.mxu1 %v3929_v18  ;;  %v3971_v18 = vld [vmem:[#allocation9 + $0x180] ss:$8 sps:$4 sm:$0xff]  }
 0x179   :  { %3071 = vmatprep.subr.bf16.mxu1 %v3937_v19  ;;  %v2176_v19 = vmax.f32 %v1840_v42, 0.0 }
 0x17a   :  { %3019 = vmatpush1.bf16.msra.mxu0 %v3908_v20  ;;  %v402_v20 = vsub.s32 2, %v4430_v37 }
 0x17b   :  { %3020 = vmatprep.subr.bf16.mxu0 %v3916_v21  ;;  %v2217_v21 = vpack.c.bf16 %v2201_v14, %v2193_v13  ;;  %v3986_v14 = vld [vmem:[#allocation9 + $0x230] ss:$8 sps:$4 sm:$0xff]  }
 0x17c   :  { %3072 = vmatpush1.bf16.msra.mxu1 %v3935_v23  ;;  %v3974_v23 = vld [vmem:[#allocation9 + $0x270] ss:$8 sps:$4 sm:$0xff]  }
 0x17d   :  { %3073 = vmatprep.subr.bf16.mxu1 %v3943_v24  ;;  %v2208_v24 = vpack.c.bf16 %v2184_v16, %v2176_v19 }
 0x17e   :  { %3021 = vmatpush2.bf16.msra.mxu0 %v3914_v26  ;;  %v1850_v26 = vadd.f32 %v4458_v43, %v1797_v60 }
 0x17f   :  { %3022 = vmatprep.subr.bf16.mxu0 %v3922_v27  ;;  %v1854_v27 = vadd.f32 %v1853_v35, %v1801_v17  ;;  %v3991_v17 = vld [vmem:[#allocation9 + $0x224] ss:$8 sps:$4 sm:$0xff]  }
 0x180   :  { %3074 = vmatpush2.bf16.msra.mxu1 %v3941_v28  ;;  %v3979_v28 = vld [vmem:[#allocation9 + $0x264] ss:$8 sps:$4 sm:$0xff]  }
 0x181   :  { %3075 = vmatprep.subr.bf16.mxu1 %v3949_v29  ;;  %v407_v29 = vrot.slane %v4433_v44, %v406_v34 }
 0x182   :  { %3023 = vmatpush2.bf16.msra.mxu0 %v3920_v30  ;;  %v403_v30 = vrot.slane %v4433_v44, %v402_v20 }
 0x183   :  { %3024 = vmatprep.subr.bf16.mxu0 %v3928_v31 }
 0x184   :  { %3076 = vmatpush2.bf16.msra.mxu1 %v3947_v33  ;;  %v3977_v33 = vld [vmem:[#allocation9 + $0x260] ss:$8 sps:$4 sm:$0xff]  }
 0x185   :  { %3077 = vmatprep.subr.bf16.mxu1 %v3955_v36  ;;  %v2192_v36 = vmax.f32 %v1850_v26, 0.0  ;;  %v4025_v26 = vld [vmem:[#allocation9 + $0x360] ss:$8 sps:$4 sm:$0xff]  }
 0x186   :  { %3025 = vmatpush2.bf16.msra.mxu0 %v3926_v38  ;;  %v2200_v38 = vmax.f32 %v1854_v27, 0.0  ;;  %v3994_v27 = vld [vmem:[#allocation9 + $0x214] ss:$8 sps:$4 sm:$0xff]  }
 0x187   :  { %3026 = vmatprep.subr.bf16.mxu0 %v3934_v39 }
 0x188   :  { %3078 = vmatpush2.bf16.msra.mxu1 %v3953_v46 }
 0x189   :  { %3079 = vmatprep.subr.bf16.mxu1 %v3961_v47 }
 0x18a   :  { %3027 = vmatpush2.bf16.msra.mxu0 %v3932_v48 }
 0x18b   :  { %3028 = vmatprep.subr.bf16.mxu0 %v3940_v50 }
 0x18c   :  { %3080 = vmatpush2.bf16.msra.mxu1 %v3959_v53  ;;  %v2216_v53 = vpack.c.bf16 %v2200_v38, %v2192_v36  ;;  %v3997_v36 = vld [vmem:[#allocation9 + $0x204] ss:$8 sps:$4 sm:$0xff]  }
 0x18d   :  { %3081 = vmatprep.subr.bf16.mxu1 %v3964_v55  ;;  %v4033_v38 = vld [vmem:[#allocation9 + $0x344] ss:$8 sps:$4 sm:$0xff]  }
 0x18e   :  { %3029 = vmatpush2.bf16.msra.mxu0 %v3938_v57  ;;  %v3985_v57 = vld [vmem:[#allocation9 + $0x244] ss:$8 sps:$4 sm:$0xff]  }
 0x18f   :  { %3030 = vmatprep.subr.bf16.mxu0 %v3946_v58 }
 0x190   :  { %3082 = vmatpush2.bf16.msra.mxu1 %v3962_v56 }
 0x191   :  { %3083 = vmatprep.subr.bf16.mxu1 %v3967_v0 }
 0x192   :  { %3031 = vmatpush2.bf16.msra.mxu0 %v3944_v59 }
 0x193   :  { %3032 = vmatprep.subr.bf16.mxu0 %v3952_v3 }
 0x194   :  { %3084 = vmatpush2.bf16.msra.mxu1 %v3965_v5  ;;  %v3988_v5 = vld [vmem:[#allocation9 + $0x234] ss:$8 sps:$4 sm:$0xff]  }
 0x195   :  { %3085 = vmatprep.subr.bf16.mxu1 %v3970_v7 }
 0x196   :  { %3033 = vmatpush2.bf16.msra.mxu0 %v3950_v9 }
 0x197   :  { %3034 = vmatprep.subr.bf16.mxu0 %v3958_v11 }
 0x198   :  { %3086 = vmatpush2.bf16.msra.mxu1 %v3968_v12 }
 0x199   :  { %3087 = vmatprep.subr.bf16.mxu1 %v3973_v63 }
 0x19a   :  { %3035 = vmatpush2.bf16.msra.mxu0 %v3956_v49  ;;  %v4022_v49 = vld [vmem:[#allocation9 + $0x370] ss:$8 sps:$4 sm:$0xff]  }
 0x19b   :  { %3110 = vmatprep.subr.bf16.mxu0 %v3976_v62  ;;  %v4027_v62 = vld [vmem:[#allocation9 + $0x364] ss:$8 sps:$4 sm:$0xff]  }
 0x19c   :  { %3088 = vmatpush2.bf16.msra.mxu1 %v3971_v18 }
 0x19d   :  { %v1892_v31 = vpop.f32.mrf.mxu0  ;;  %3037 = vmatmul.mubr.bf16.vlgmr.msra.gmra.mxu0 %v2208_v24  ;;  %3163 = vmatprep.subr.bf16.mxu1 %v4024_v22  ;;  %v3989_v24 = vld [vmem:[#allocation9 + $0x220] ss:$8 sps:$4 sm:$0xff]  }
 0x19e   :  { %3046 = vmatprep.mubr.bf16.mxu0 %v2217_v21  ;;  %3111 = vmatpush1.bf16.msra.mxu0 %v3974_v23  ;;  %v1893_v47 = vadd.f32 %v1892_v31, %v403_v30 }
 0x19f   :  { %v1945_v32 = vpop.f32.mrf.mxu1  ;;  %v1894_v39 = vpop.f32.mrf.mxu0  ;;  %3112 = vmatprep.subr.bf16.mxu0 %v3979_v28  ;;  %v4030_v28 = vld [vmem:[#allocation9 + $0x354] ss:$8 sps:$4 sm:$0xff]  }
 0x1a0   :  { %v1895_v43 = vadd.f32 %v1894_v39, %v407_v29  ;;  %v1946_v15 = vadd.f32 %v1945_v32, %v1893_v47  ;;  %v3995_v39 = vld [vmem:[#allocation9 + $0x200] ss:$8 sps:$4 sm:$0xff]   ;;  %v3998_v47 = vld [vmem:[#allocation9 + $0x2f0] ss:$8 sps:$4 sm:$0xff]  }
 0x1a1   :  { %v1947_v46 = vpop.f32.mrf.mxu1  ;;  %v1896_v48 = vpop.f32.mrf.mxu0 }
 0x1a2   :  { %v1897_v50 = vadd.f32 %v1896_v48, %v403_v30  ;;  %3113 = vmatpush1.bf16.msra.mxu0 %v3977_v33  ;;  %v1948_v58 = vadd.f32 %v1947_v46, %v1895_v43  ;;  %v2178_v10 = vmax.f32 %v1946_v15, 0.0  ;;  %v4028_v33 = vld [vmem:[#allocation9 + $0x350] ss:$8 sps:$4 sm:$0xff]   ;;  %v4000_v43 = vld [vmem:[#allocation9 + $0x2f4] ss:$8 sps:$4 sm:$0xff]  }
 0x1a3   :  { %v1949_v52 = vpop.f32.mrf.mxu1  ;;  %v1898_v55 = vpop.f32.mrf.mxu0  ;;  %3114 = vmatprep.subr.bf16.mxu0 %v3982_v40  ;;  %v4031_v40 = vld [vmem:[#allocation9 + $0x340] ss:$8 sps:$4 sm:$0xff]   ;;  %v4036_v46 = vld [vmem:[#allocation9 + $0x334] ss:$8 sps:$4 sm:$0xff]   ;;  %v4034_v48 = vld [vmem:[#allocation9 + $0x330] ss:$8 sps:$4 sm:$0xff]  }
 0x1a4   :  { %v1950_v45 = vadd.f32 %v1949_v52, %v1897_v50  ;;  %v1899_v35 = vadd.f32 %v1898_v55, %v407_v29  ;;  %v2179_v6 = vmax.f32 %v1948_v58, 0.0  ;;  %v4003_v50 = vld [vmem:[#allocation9 + $0x2e4] ss:$8 sps:$4 sm:$0xff]   ;;  %v4006_v55 = vld [vmem:[#allocation9 + $0x2d4] ss:$8 sps:$4 sm:$0xff]  }
 0x1a5   :  { %v1951_v56 = vpop.f32.mrf.mxu1  ;;  %v1902_v0 = vpop.f32.mrf.mxu0  ;;  %3047 = vmatmul.mubr.bf16.gmra.mxu0 %v2216_v53  ;;  %v4039_v52 = vld [vmem:[#allocation9 + $0x324] ss:$8 sps:$4 sm:$0xff]   ;;  %v4037_v53 = vld [vmem:[#allocation9 + $0x320] ss:$8 sps:$4 sm:$0xff]   ;;  %v4004_v58 = vld [vmem:[#allocation9 + $0x2d0] ss:$8 sps:$4 sm:$0xff]  }
 0x1a6   :  { %v1952_v59 = vadd.f32 %v1951_v56, %v1899_v35  ;;  %v1903_v1 = vadd.f32 %v1902_v0, %v403_v30  ;;  %3115 = vmatpush1.bf16.msra.mxu0 %v3980_v25  ;;  %v2186_v3 = vmax.f32 %v1950_v45, 0.0  ;;  %v4001_v25 = vld [vmem:[#allocation9 + $0x2e0] ss:$8 sps:$4 sm:$0xff]   ;;  %v4040_v45 = vld [vmem:[#allocation9 + $0x310] ss:$8 sps:$4 sm:$0xff]  }
 0x1a7   :  { %v1955_v51 = vpop.f32.mrf.mxu1  ;;  %v1904_v4 = vpop.f32.mrf.mxu0  ;;  %3116 = vmatprep.subr.bf16.mxu0 %v3985_v57  ;;  %v4042_v57 = vld [vmem:[#allocation9 + $0x314] ss:$8 sps:$4 sm:$0xff]   ;;  %v4009_v35 = vld [vmem:[#allocation9 + $0x2c4] ss:$8 sps:$4 sm:$0xff]   ;;  %v4007_v15 = vld [vmem:[#allocation9 + $0x2c0] ss:$8 sps:$4 sm:$0xff]  }
 0x1a8   :  { %v2187_v7 = vmax.f32 %v1952_v59, 0.0  ;;  %v1905_v8 = vadd.f32 %v1904_v4, %v407_v29  ;;  %v1956_v61 = vadd.f32 %v1955_v51, %v1903_v1  ;;  %v2210_v16 = vpack.c.bf16 %v2186_v3, %v2178_v10  ;;  %v4045_v56 = vld [vmem:[#allocation9 + $0x304] ss:$8 sps:$4 sm:$0xff]   ;;  %v4043_v0 = vld [vmem:[#allocation9 + $0x300] ss:$8 sps:$4 sm:$0xff]  }
 0x1a9   :  { %v1957_v9 = vpop.f32.mrf.mxu1  ;;  %v1906_v11 = vpop.f32.mrf.mxu0  ;;  %v4012_v59 = vld [vmem:[#allocation9 + $0x2b4] ss:$8 sps:$4 sm:$0xff]   ;;  %v4010_v51 = vld [vmem:[#allocation9 + $0x2b0] ss:$8 sps:$4 sm:$0xff]   ;;  %v4015_v3 = vld [vmem:[#allocation9 + $0x2a4] ss:$8 sps:$4 sm:$0xff]  }
 0x1aa   :  { %v2211_v12 = vpack.c.bf16 %v2187_v7, %v2179_v6  ;;  %v1907_v42 = vadd.f32 %v1906_v11, %v403_v30  ;;  %v1958_v63 = vadd.f32 %v1957_v9, %v1905_v8  ;;  %3117 = vmatpush1.bf16.msra.mxu0 %v3983_v2  ;;  %v2194_v20 = vmax.f32 %v1956_v61, 0.0  ;;  %v4048_v1 = vld [vmem:[#allocation9 + $0x3f4] ss:$8 sps:$4 sm:$0xff]   ;;  %v4046_v2 = vld [vmem:[#allocation9 + $0x3f0] ss:$8 sps:$4 sm:$0xff]  }
 0x1ab   :  { %v1959_v13 = vpop.f32.mrf.mxu1  ;;  %v1908_v60 = vpop.f32.mrf.mxu0  ;;  %3118 = vmatprep.subr.bf16.mxu0 %v3988_v5  ;;  %v4051_v4 = vld [vmem:[#allocation9 + $0x3e4] ss:$8 sps:$4 sm:$0xff]   ;;  %v4013_v5 = vld [vmem:[#allocation9 + $0x2a0] ss:$8 sps:$4 sm:$0xff]   ;;  %v4018_v7 = vld [vmem:[#allocation9 + $0x294] ss:$8 sps:$4 sm:$0xff]  }
 0x1ac   :  { %v1909_v34 = vadd.f32 %v1908_v60, %v407_v29  ;;  %v1960_v18 = vadd.f32 %v1959_v13, %v1907_v42  ;;  %3089 = vmatprep.mubr.bf16.mxu1 %v2211_v12  ;;  %v2195_v22 = vmax.f32 %v1958_v63, 0.0  ;;  %v3992_v29 = vld [vmem:[#allocation9 + $0x210] ss:$8 sps:$4 sm:$0xff]   ;;  %v4049_v6 = vld [vmem:[#allocation9 + $0x3e0] ss:$8 sps:$4 sm:$0xff]   ;;  %v414_v13 = vsub.s32 5, %v4430_v37 }
 0x1ad   :  { %v1961_v19 = vpop.f32.mrf.mxu1  ;;  %3090 = vmatmul.mubr.bf16.vlgmr.msra.gmra.mxu1 %v2210_v16  ;;  %v4054_v8 = vld [vmem:[#allocation9 + $0x3d4] ss:$8 sps:$4 sm:$0xff]   ;;  %v4016_v9 = vld [vmem:[#allocation9 + $0x290] ss:$8 sps:$4 sm:$0xff]   ;;  %v4021_v61 = vld [vmem:[#allocation9 + $0x284] ss:$8 sps:$4 sm:$0xff]  }
 0x1ae   :  { %v2202_v21 = vmax.f32 %v1960_v18, 0.0  ;;  %v1962_v23 = vadd.f32 %v1961_v19, %v1909_v34  ;;  %3119 = vmatpush1.bf16.msra.mxu0 %v3986_v14  ;;  %3164 = vmatpush1.bf16.msra.mxu1 %v4022_v49  ;;  %v4052_v10 = vld [vmem:[#allocation9 + $0x3d0] ss:$8 sps:$4 sm:$0xff]   ;;  %v4057_v11 = vld [vmem:[#allocation9 + $0x3c4] ss:$8 sps:$4 sm:$0xff]   ;;  %v410_v14 = vsub.s32 4, %v4430_v37  ;;  %v415_v60 = vrot.slane %v4433_v44, %v414_v13 }
 0x1af   :  { %3120 = vmatprep.subr.bf16.mxu0 %v3991_v17  ;;  %3165 = vmatprep.subr.bf16.mxu1 %v4027_v62  ;;  %v4019_v12 = vld [vmem:[#allocation9 + $0x280] ss:$8 sps:$4 sm:$0xff]   ;;  %v4060_v63 = vld [vmem:[#allocation9 + $0x3b4] ss:$8 sps:$4 sm:$0xff]   ;;  %v4058_v49 = vld [vmem:[#allocation9 + $0x3b0] ss:$8 sps:$4 sm:$0xff]  }
 0x1b0   :  { %v2203_v30 = vmax.f32 %v1962_v23, 0.0  ;;  %v2218_v31 = vpack.c.bf16 %v2202_v21, %v2194_v20  ;;  %v4055_v42 = vld [vmem:[#allocation9 + $0x3c0] ss:$8 sps:$4 sm:$0xff]   ;;  %v4063_v16 = vld [vmem:[#allocation9 + $0x3a4] ss:$8 sps:$4 sm:$0xff]   ;;  %v411_v17 = vrot.slane %v4433_v44, %v410_v14 }
 0x1b1   :  { %v4061_v18 = vld [vmem:[#allocation9 + $0x3a0] ss:$8 sps:$4 sm:$0xff]   ;;  %v4066_v20 = vld [vmem:[#allocation9 + $0x394] ss:$8 sps:$4 sm:$0xff]  }
 0x1b2   :  { %v2219_v32 = vpack.c.bf16 %v2203_v30, %v2195_v22  ;;  %3121 = vmatpush1.bf16.msra.mxu0 %v3989_v24  ;;  %3166 = vmatpush1.bf16.msra.mxu1 %v4025_v26 }
 0x1b3   :  { %3122 = vmatprep.subr.bf16.mxu0 %v3994_v27  ;;  %3167 = vmatprep.subr.bf16.mxu1 %v4030_v28  ;;  %v4064_v28 = vld [vmem:[#allocation9 + $0x390] ss:$8 sps:$4 sm:$0xff]  }
 0x1b4   :  { %3099 = vmatprep.mubr.bf16.mxu1 %v2219_v32 }
 0x1b5   :  { %3100 = vmatmul.mubr.bf16.gmra.mxu1 %v2218_v31  ;;  %v4069_v31 = vld [vmem:[#allocation9 + $0x384] ss:$8 sps:$4 sm:$0xff]  }
 0x1b6   :  { %3123 = vmatpush1.bf16.msra.mxu0 %v3992_v29  ;;  %3168 = vmatpush1.bf16.msra.mxu1 %v4028_v33 }
 0x1b7   :  { %3124 = vmatprep.subr.bf16.mxu0 %v3997_v36  ;;  %3169 = vmatprep.subr.bf16.mxu1 %v4033_v38 }
 0x1ba   :  { %3125 = vmatpush1.bf16.msra.mxu0 %v3995_v39  ;;  %3170 = vmatpush1.bf16.msra.mxu1 %v4031_v40 }
 0x1bb   :  { %3126 = vmatprep.subr.bf16.mxu0 %v4000_v43  ;;  %3171 = vmatprep.subr.bf16.mxu1 %v4036_v46 }
 0x1be   :  { %3127 = vmatpush2.bf16.msra.mxu0 %v3998_v47  ;;  %3172 = vmatpush1.bf16.msra.mxu1 %v4034_v48  ;;  %v4067_v47 = vld [vmem:[#allocation9 + $0x380] ss:$8 sps:$4 sm:$0xff]  }
 0x1bf   :  { %3128 = vmatprep.subr.bf16.mxu0 %v4003_v50  ;;  %3173 = vmatprep.subr.bf16.mxu1 %v4039_v52 }
 0x1c2   :  { %3129 = vmatpush2.bf16.msra.mxu0 %v4001_v25  ;;  %3174 = vmatpush1.bf16.msra.mxu1 %v4037_v53 }
 0x1c3   :  { %3130 = vmatprep.subr.bf16.mxu0 %v4006_v55  ;;  %3175 = vmatprep.subr.bf16.mxu1 %v4042_v57 }
 0x1c6   :  { %3131 = vmatpush2.bf16.msra.mxu0 %v4004_v58  ;;  %3176 = vmatpush1.bf16.msra.mxu1 %v4040_v45 }
 0x1c7   :  { %3132 = vmatprep.subr.bf16.mxu0 %v4009_v35  ;;  %3177 = vmatprep.subr.bf16.mxu1 %v4045_v56 }
 0x1ca   :  { %3133 = vmatpush2.bf16.msra.mxu0 %v4007_v15  ;;  %3178 = vmatpush1.bf16.msra.mxu1 %v4043_v0 }
 0x1cb   :  { %3134 = vmatprep.subr.bf16.mxu0 %v4012_v59  ;;  %3179 = vmatprep.subr.bf16.mxu1 %v4048_v1 }
 0x1ce   :  { %3135 = vmatpush2.bf16.msra.mxu0 %v4010_v51  ;;  %3180 = vmatpush2.bf16.msra.mxu1 %v4046_v2 }
 0x1cf   :  { %3136 = vmatprep.subr.bf16.mxu0 %v4015_v3  ;;  %3181 = vmatprep.subr.bf16.mxu1 %v4051_v4 }
 0x1d2   :  { %3137 = vmatpush2.bf16.msra.mxu0 %v4013_v5  ;;  %3182 = vmatpush2.bf16.msra.mxu1 %v4049_v6 }
 0x1d3   :  { %3138 = vmatprep.subr.bf16.mxu0 %v4018_v7  ;;  %3183 = vmatprep.subr.bf16.mxu1 %v4054_v8 }
 0x1d6   :  { %3139 = vmatpush2.bf16.msra.mxu0 %v4016_v9  ;;  %3184 = vmatpush2.bf16.msra.mxu1 %v4052_v10 }
 0x1d7   :  { %3140 = vmatprep.subr.bf16.mxu0 %v4021_v61  ;;  %3185 = vmatprep.subr.bf16.mxu1 %v4057_v11  ;;  %v422_v61 = vsub.s32 7, %v4430_v37  ;;  %v418_v11 = vsub.s32 6, %v4430_v37 }
 0x1da   :  { %3141 = vmatpush2.bf16.msra.mxu0 %v4019_v12  ;;  %3186 = vmatpush2.bf16.msra.mxu1 %v4055_v42  ;;  %v423_v12 = vrot.slane %v4433_v44, %v422_v61  ;;  %v419_v42 = vrot.slane %v4433_v44, %v418_v11 }
 0x1db   :  { %3187 = vmatprep.subr.bf16.mxu1 %v4060_v63 }
 0x1dd   :  { %v1998_v62 = vpop.f32.mrf.mxu0 }
 0x1de   :  { %3188 = vmatpush2.bf16.msra.mxu1 %v4058_v49  ;;  %v1999_v23 = vadd.f32 %v1998_v62, %v411_v17 }
 0x1df   :  { %v2051_v34 = vpop.f32.mrf.mxu1  ;;  %v2000_v19 = vpop.f32.mrf.mxu0  ;;  %3189 = vmatprep.subr.bf16.mxu1 %v4063_v16 }
 0x1e0   :  { %v2001_v22 = vadd.f32 %v2000_v19, %v415_v60  ;;  %v2052_v38 = vadd.f32 %v2051_v34, %v1999_v23 }
 0x1e1   :  { %v2053_v21 = vpop.f32.mrf.mxu1  ;;  %v2002_v24 = vpop.f32.mrf.mxu0 }
 0x1e2   :  { %v2003_v26 = vadd.f32 %v2002_v24, %v411_v17  ;;  %3190 = vmatpush2.bf16.msra.mxu1 %v4061_v18  ;;  %v2054_v32 = vadd.f32 %v2053_v21, %v2001_v22  ;;  %v2180_v57 = vmax.f32 %v2052_v38, 0.0 }
 0x1e3   :  { %v2055_v27 = vpop.f32.mrf.mxu1  ;;  %v2004_v30 = vpop.f32.mrf.mxu0  ;;  %3191 = vmatprep.subr.bf16.mxu1 %v4066_v20 }
 0x1e4   :  { %v2056_v29 = vadd.f32 %v2055_v27, %v2003_v26  ;;  %v2005_v33 = vadd.f32 %v2004_v30, %v415_v60  ;;  %v2181_v52 = vmax.f32 %v2054_v32, 0.0 }
 0x1e5   :  { %v2057_v36 = vpop.f32.mrf.mxu1  ;;  %v2008_v39 = vpop.f32.mrf.mxu0 }
 0x1e6   :  { %v2058_v40 = vadd.f32 %v2057_v36, %v2005_v33  ;;  %v2009_v43 = vadd.f32 %v2008_v39, %v411_v17  ;;  %3192 = vmatpush2.bf16.msra.mxu1 %v4064_v28  ;;  %v2188_v48 = vmax.f32 %v2056_v29, 0.0 }
 0x1e7   :  { %v2061_v46 = vpop.f32.mrf.mxu1  ;;  %v2010_v50 = vpop.f32.mrf.mxu0  ;;  %3193 = vmatprep.subr.bf16.mxu1 %v4069_v31 }
 0x1e8   :  { %v2189_v25 = vmax.f32 %v2058_v40, 0.0  ;;  %v2011_v53 = vadd.f32 %v2010_v50, %v415_v60  ;;  %v2062_v58 = vadd.f32 %v2061_v46, %v2009_v43  ;;  %v2212_v59 = vpack.c.bf16 %v2188_v48, %v2180_v57 }
 0x1e9   :  { %v2063_v55 = vpop.f32.mrf.mxu1  ;;  %v2012_v45 = vpop.f32.mrf.mxu0 }
 0x1ea   :  { %v2213_v35 = vpack.c.bf16 %v2189_v25, %v2181_v52  ;;  %v2013_v56 = vadd.f32 %v2012_v45, %v411_v17  ;;  %v2064_v15 = vadd.f32 %v2063_v55, %v2011_v53  ;;  %3194 = vmatpush2.bf16.msra.mxu1 %v4067_v47  ;;  %v2196_v4 = vmax.f32 %v2062_v58, 0.0 }
 0x1eb   :  { %v2065_v0 = vpop.f32.mrf.mxu1  ;;  %v2014_v1 = vpop.f32.mrf.mxu0 }
 0x1ec   :  { %v2015_v51 = vadd.f32 %v2014_v1, %v415_v60  ;;  %v2066_v2 = vadd.f32 %v2065_v0, %v2013_v56  ;;  %3142 = vmatprep.mubr.bf16.mxu0 %v2213_v35  ;;  %v2197_v5 = vmax.f32 %v2064_v15, 0.0 }
 0x1ed   :  { %v2067_v3 = vpop.f32.mrf.mxu1  ;;  %3143 = vmatmul.mubr.bf16.vlgmr.msra.gmra.mxu0 %v2212_v59 }
 0x1ee   :  { %v2204_v6 = vmax.f32 %v2066_v2, 0.0  ;;  %v2068_v7 = vadd.f32 %v2067_v3, %v2015_v51 }
 0x1f0   :  { %v2205_v8 = vmax.f32 %v2068_v7, 0.0  ;;  %v2220_v9 = vpack.c.bf16 %v2204_v6, %v2196_v4 }
 0x1f2   :  { %v2221_v10 = vpack.c.bf16 %v2205_v8, %v2197_v5 }
 0x1f4   :  { %3152 = vmatprep.mubr.bf16.mxu0 %v2221_v10 }
 0x1f5   :  { %3153 = vmatmul.mubr.bf16.gmra.mxu0 %v2220_v9 }
 0x21d   :  { %v2104_v63 = vpop.f32.mrf.mxu0 }
 0x21e   :  { %v2105_v60 = vadd.f32 %v2104_v63, %v419_v42 }
 0x21f   :  { %v2157_v13 = vpop.f32.mrf.mxu1  ;;  %v2106_v14 = vpop.f32.mrf.mxu0 }
 0x220   :  { %v2107_v49 = vadd.f32 %v2106_v14, %v423_v12  ;;  %v2158_v23 = vadd.f32 %v2157_v13, %v2105_v60 }
 0x221   :  { %v2159_v16 = vpop.f32.mrf.mxu1  ;;  %v2108_v17 = vpop.f32.mrf.mxu0 }
 0x222   :  { %v2109_v62 = vadd.f32 %v2108_v17, %v419_v42  ;;  %v2160_v19 = vadd.f32 %v2159_v16, %v2107_v49  ;;  %v2182_v33 = vmax.f32 %v2158_v23, 0.0 }
 0x223   :  { %v2161_v34 = vpop.f32.mrf.mxu1  ;;  %v2110_v18 = vpop.f32.mrf.mxu0 }
 0x224   :  { %v2162_v20 = vadd.f32 %v2161_v34, %v2109_v62  ;;  %v2111_v22 = vadd.f32 %v2110_v18, %v423_v12  ;;  %v2183_v30 = vmax.f32 %v2160_v19, 0.0 }
 0x225   :  { %v2163_v21 = vpop.f32.mrf.mxu1  ;;  %v2114_v24 = vpop.f32.mrf.mxu0 }
 0x226   :  { %v2164_v26 = vadd.f32 %v2163_v21, %v2111_v22  ;;  %v2190_v28 = vmax.f32 %v2162_v20, 0.0  ;;  %v2115_v36 = vadd.f32 %v2114_v24, %v419_v42 }
 0x227   :  { %v2167_v27 = vpop.f32.mrf.mxu1  ;;  %v2116_v44 = vpop.f32.mrf.mxu0 }
 0x228   :  { %v2191_v31 = vmax.f32 %v2164_v26, 0.0  ;;  %v2117_v32 = vadd.f32 %v2116_v44, %v423_v12  ;;  %v2214_v46 = vpack.c.bf16 %v2190_v28, %v2182_v33  ;;  %v2168_v25 = vadd.f32 %v2167_v27, %v2115_v36  ;;  %v3224_v44 = vld [vmem:[#allocation11] sm:$0xff] }
 0x229   :  { %v2169_v29 = vpop.f32.mrf.mxu1  ;;  %v2118_v38 = vpop.f32.mrf.mxu0 }
 0x22a   :  { %v2215_v39 = vpack.c.bf16 %v2191_v31, %v2183_v30  ;;  %v2119_v40 = vadd.f32 %v2118_v38, %v419_v42  ;;  %v2170_v48 = vadd.f32 %v2169_v29, %v2117_v32  ;;  %v2198_v35 = vmax.f32 %v2168_v25, 0.0  ;;  %v2352_v42 = vld [vmem:[%s4520_s4] sm:$0x3]  ;;  %s4287_s4 = smov [#allocation15]  }
 0x22b   :  { %v2171_v43 = vpop.f32.mrf.mxu1  ;;  %v2120_v47 = vpop.f32.mrf.mxu0  ;;  %v2357_v13 = vrot.slane %v2352_v42, %v394_v54  ;;  %v2361_v49 = vrot.slane %v2352_v42, %v398_v41  ;;  %v3228_v42 = vld [vmem:[#allocation11 + $0x20] sm:$0xff]  ;;  %s3429_s24 = sshll.u32 %s4287_s4, 4  ;;  %s3430_s24 = int_to_ptr.vmem [resolvable:$true] %s3429_s24 }
 0x22c   :  { %v2172_v50 = vadd.f32 %v2171_v43, %v2119_v40  ;;  %v2121_v52 = vadd.f32 %v2120_v47, %v423_v12  ;;  %3195 = vmatprep.mubr.bf16.mxu1 %v2215_v39  ;;  %v2199_v58 = vmax.f32 %v2170_v48, 0.0  ;;  %v3225_v39 = vld [vmem:[#allocation11 + $0x8] sm:$0xff]  ;;  %v3272_v43 = vld [vmem:[#allocation14] sm:$0xff]  ;;  %s4234_s25 = scalar_lea.vmem %s3430_s24, 1024  ;;  %p4239_p8 = scmp.lt.s32.totalorder %s3430_s24, %s3430_s24 }
 0x22d   :  { %v2173_v53 = vpop.f32.mrf.mxu1  ;;  %3196 = vmatmul.mubr.bf16.vlgmr.msra.gmra.mxu1 %v2214_v46  ;;  %p4235_p7 = scmp.ne.s32.totalorder %s3430_s24, %s4234_s25  ;;  %p4240_p9 = scmp.lt.s32.totalorder %s4234_s25, %s4234_s25 }
 0x22e   :  { %v2174_v55 = vadd.f32 %v2173_v53, %v2121_v52  ;;  %v2206_v57 = vmax.f32 %v2172_v50, 0.0  ;;  %v3248_v52 = vld [vmem:[#allocation12] sm:$0xff] }
 0x22f   :  { %p4241_p10 = por %p4240_p9, %p4239_p8 }
 0x230   :  { %v2207_v45 = vmax.f32 %v2174_v55, 0.0  ;;  %v2222_v15 = vpack.c.bf16 %v2206_v57, %v2198_v35  ;;  %v3273_v35 = vld [vmem:[#allocation14 + $0x8] sm:$0xff] }
 0x231   :  { %p4242_p11 = pnand %p4241_p10, %p4235_p7 }
 0x232   :  { %v2223_v56 = vpack.c.bf16 %v2207_v45, %v2199_v58  ;;  %v3226_v58 = vld [vmem:[#allocation11 + $0x10] sm:$0xff] }
 0x234   :  { %3205 = vmatprep.mubr.bf16.mxu1 %v2223_v56 }
 0x235   :  { %3206 = vmatmul.mubr.bf16.gmra.mxu1 %v2222_v15 }
 0x25d   :  { %v3038_v0 = vpop.f32.mrf.mxu0 }
 0x25e   :  { %v3039_v60 = vadd.f32 %v3038_v0, %v2357_v13 }
 0x25f   :  { %v3040_v59 = vpop.f32.mrf.mxu0 }
 0x260   :  { %v3041_v62 = vadd.f32 %v3040_v59, %v2361_v49 }
 0x261   :  { %v3042_v1 = vpop.f32.mrf.mxu0 }
 0x262   :  { %v3043_v19 = vadd.f32 %v3042_v1, %v2357_v13 }
 0x263   :  { %v3044_v51 = vpop.f32.mrf.mxu0 }
 0x264   :  { %v3045_v24 = vadd.f32 %v3044_v51, %v2361_v49  ;;  %v3249_v51 = vld [vmem:[#allocation12 + $0x8] sm:$0xff] }
 0x265   :  { %v3048_v2 = vpop.f32.mrf.mxu0 }
 0x266   :  { %v3049_v54 = vadd.f32 %v3048_v2, %v2357_v13 }
 0x267   :  { %v3050_v3 = vpop.f32.mrf.mxu0 }
 0x268   :  { %v3051_v33 = vadd.f32 %v3050_v3, %v2361_v49 }
 0x269   :  { %v3052_v5 = vpop.f32.mrf.mxu0 }
 0x26a   :  { %v3053_v36 = vadd.f32 %v3052_v5, %v2357_v13  ;;  %v3227_v5 = vld [vmem:[#allocation11 + $0x18] sm:$0xff] }
 0x26b   :  { %v3054_v7 = vpop.f32.mrf.mxu0 }
 0x26c   :  { %v3055_v25 = vadd.f32 %v3054_v7, %v2361_v49 }
 0x26d   :  { %v3091_v4 = vpop.f32.mrf.mxu1 }
 0x26e   :  { %v3092_v34 = vadd.f32 %v3091_v4, %v3039_v60 }
 0x26f   :  { %v3093_v6 = vpop.f32.mrf.mxu1 }
 0x270   :  { %v3094_v20 = vadd.f32 %v3093_v6, %v3041_v62 }
 0x271   :  { %v3095_v8 = vpop.f32.mrf.mxu1 }
 0x272   :  { %v3096_v26 = vadd.f32 %v3095_v8, %v3043_v19  ;;  %v3229_v19 = vld [vmem:[#allocation11 + $0x28] sm:$0xff] }
 0x273   :  { %v3097_v10 = vpop.f32.mrf.mxu1 }
 0x274   :  { %v3098_v37 = vadd.f32 %v3097_v10, %v3045_v24 }
 0x275   :  { %v3101_v11 = vpop.f32.mrf.mxu1 }
 0x276   :  { %v3102_v38 = vadd.f32 %v3101_v11, %v3049_v54  ;;  %v3274_v11 = vld [vmem:[#allocation14 + $0x10] sm:$0xff] }
 0x277   :  { %v3103_v63 = vpop.f32.mrf.mxu1 }
 0x278   :  { %v3104_v53 = vadd.f32 %v3103_v63, %v3051_v33  ;;  %v3276_v33 = vld [vmem:[#allocation14 + $0x20] sm:$0xff] }
 0x279   :  { %v3105_v16 = vpop.f32.mrf.mxu1 }
 0x27a   :  { %v3106_v55 = vadd.f32 %v3105_v16, %v3053_v36 }
 0x27b   :  { %v3107_v18 = vpop.f32.mrf.mxu1 }
 0x27c   :  { %v3108_v2 = vadd.f32 %v3107_v18, %v3055_v25  ;;  %v3250_v18 = vld [vmem:[#allocation12 + $0x10] sm:$0xff] }
 0x2ad   :  { %v3144_v9 = vpop.f32.mrf.mxu0 }
 0x2ae   :  { %v3145_v22 = vadd.f32 %v3144_v9, %v3092_v34  ;;  %v3275_v34 = vld [vmem:[#allocation14 + $0x18] sm:$0xff] }
 0x2af   :  { %v3146_v61 = vpop.f32.mrf.mxu0 }
 0x2b0   :  { %v3147_v27 = vadd.f32 %v3146_v61, %v3094_v20 }
 0x2b1   :  { %v3148_v12 = vpop.f32.mrf.mxu0 }
 0x2b2   :  { %v3149_v41 = vadd.f32 %v3148_v12, %v3096_v26 }
 0x2b3   :  { %v3150_v14 = vpop.f32.mrf.mxu0 }
 0x2b4   :  { %v3151_v46 = vadd.f32 %v3150_v14, %v3098_v37 }
 0x2b5   :  { %v3154_v17 = vpop.f32.mrf.mxu0 }
 0x2b6   :  { %v3155_v57 = vadd.f32 %v3154_v17, %v3102_v38 }
 0x2b7   :  { %v3156_v21 = vpop.f32.mrf.mxu0 }
 0x2b8   :  { %v3157_v3 = vadd.f32 %v3156_v21, %v3104_v53  ;;  %v3253_v53 = vld [vmem:[#allocation12 + $0x28] sm:$0xff] }
 0x2b9   :  { %v3158_v31 = vpop.f32.mrf.mxu0 }
 0x2ba   :  { %v3159_v4 = vadd.f32 %v3158_v31, %v3106_v55 }
 0x2bb   :  { %v3160_v56 = vpop.f32.mrf.mxu0 }
 0x2bc   :  { %v3161_v12 = vadd.f32 %v3160_v56, %v3108_v2 }
 0x2ed   :  { %v3197_v23 = vpop.f32.mrf.mxu1 }
 0x2ee   :  { %v3198_v28 = vadd.f32 %v3197_v23, %v3145_v22 }
 0x2ef   :  { %v3199_v30 = vpop.f32.mrf.mxu1 }
 0x2f0   :  { %v3216_v32 = vmax.f32 %v3198_v28, 0.0  ;;  %v3200_v29 = vadd.f32 %v3199_v30, %v3147_v27  ;;  %v3230_v30 = vld [vmem:[#allocation11 + $0x30] sm:$0xff] }
 0x2f1   :  { %v3201_v40 = vpop.f32.mrf.mxu1 }
 0x2f2   :  { %v3232_v47 = vadd.f32 %v3224_v44, %v3216_v32  ;;  %v3217_v48 = vmax.f32 %v3200_v29, 0.0  ;;  %v3202_v50 = vadd.f32 %v3201_v40, %v3149_v41  ;;  %v3251_v44 = vld [vmem:[#allocation12 + $0x18] sm:$0xff] }
 0x2f3   :  { %v3203_v45 = vpop.f32.mrf.mxu1 }
 0x2f4   :  { %3240 = vst [vmem:[#allocation15] sm:$0xff] %v3232_v47  ;;  %v3233_v15 = vadd.f32 %v3225_v39, %v3217_v48  ;;  %v3218_v0 = vmax.f32 %v3202_v50, 0.0  ;;  %v3204_v59 = vadd.f32 %v3203_v45, %v3151_v46  ;;  %v3280_v1 = vsub.f32 %v3232_v47, %v3272_v43  ;;  %v3277_v43 = vld [vmem:[#allocation14 + $0x28] sm:$0xff]  ;;  %v3252_v46 = vld [vmem:[#allocation12 + $0x20] sm:$0xff] }
 0x2f5   :  { %v3207_v6 = vpop.f32.mrf.mxu1  ;;  %v3256_v8 = vsub.f32 %v3232_v47, %v3248_v52  ;;  %v3231_v47 = vld [vmem:[#allocation11 + $0x38] sm:$0xff] }
 0x2f6   :  { %3241 = vst [vmem:[#allocation15 + $0x8] sm:$0xff] %v3233_v15  ;;  %v3234_v7 = vadd.f32 %v3226_v58, %v3218_v0  ;;  %v3219_v9 = vmax.f32 %v3204_v59, 0.0  ;;  %v3208_v10 = vadd.f32 %v3207_v6, %v3155_v57  ;;  %v3281_v61 = vsub.f32 %v3233_v15, %v3273_v35  ;;  %v3278_v59 = vld [vmem:[#allocation14 + $0x30] sm:$0xff] }
 0x2f7   :  { %v3209_v63 = vpop.f32.mrf.mxu1  ;;  %v3288_v13 = vadd.f32 1e-06, %v3280_v1  ;;  %v3257_v14 = vsub.f32 %v3233_v15, %v3249_v51  ;;  %v3264_v49 = vadd.f32 1e-06, %v3256_v8  ;;  %v3279_v1 = vld [vmem:[#allocation14 + $0x38] sm:$0xff] }
 0x2f8   :  { %3242 = vst [vmem:[#allocation15 + $0x10] sm:$0xff] %v3234_v7  ;;  %v3235_v16 = vadd.f32 %v3227_v5, %v3219_v9  ;;  %v3220_v60 = vmax.f32 %v3208_v10, 0.0  ;;  %v3210_v17 = vadd.f32 %v3209_v63, %v3157_v3  ;;  %v3289_v62 = vadd.f32 1e-06, %v3281_v61  ;;  %v3254_v5 = vld [vmem:[#allocation12 + $0x30] sm:$0xff]  ;;  %v3255_v10 = vld [vmem:[#allocation12 + $0x38] sm:$0xff] }
 0x2f9   :  { %v3211_v20 = vpop.f32.mrf.mxu1  ;;  %v3344_v22 = vmul.f32 %v3288_v13, %v3288_v13  ;;  %v3265_v21 = vadd.f32 1e-06, %v3257_v14  ;;  %v3296_v23 = vmul.f32 %v3264_v49, %v3264_v49  ;;  %v3282_v24 = vsub.f32 %v3234_v7, %v3274_v11 }
 0x2fa   :  { %3243 = vst [vmem:[#allocation15 + $0x18] sm:$0xff] %v3235_v16  ;;  %v3236_v26 = vadd.f32 %v3228_v42, %v3220_v60  ;;  %v3221_v27 = vmax.f32 %v3210_v17, 0.0  ;;  %v3212_v28 = vadd.f32 %v3211_v20, %v3159_v4  ;;  %v3345_v54 = vmul.f32 %v3289_v62, %v3289_v62 }
 0x2fb   :  { %v3213_v37 = vpop.f32.mrf.mxu1  ;;  %v3297_v41 = vmul.f32 %v3265_v21, %v3265_v21  ;;  %v3283_v31 = vsub.f32 %v3235_v16, %v3275_v34  ;;  %v3290_v32 = vadd.f32 1e-06, %v3282_v24  ;;  %v3258_v29 = vsub.f32 %v3234_v7, %v3250_v18 }
 0x2fc   :  { %3244 = vst [vmem:[#allocation15 + $0x20] sm:$0xff] %v3236_v26  ;;  %v3237_v36 = vadd.f32 %v3229_v19, %v3221_v27  ;;  %v3222_v38 = vmax.f32 %v3212_v28, 0.0  ;;  %v3214_v39 = vadd.f32 %v3213_v37, %v3161_v12  ;;  %v3352_v40 = vadd.f32 %v3345_v54, %v3344_v22 }
 0x2fd   :  { %v3304_v48 = vadd.f32 %v3297_v41, %v3296_v23  ;;  %v3291_v50 = vadd.f32 1e-06, %v3283_v31  ;;  %v3346_v52 = vmul.f32 %v3290_v32, %v3290_v32  ;;  %v3259_v25 = vsub.f32 %v3235_v16, %v3251_v44 }
 0x2fe   :  { %3245 = vst [vmem:[#allocation15 + $0x28] sm:$0xff] %v3237_v36  ;;  %v3238_v55 = vadd.f32 %v3230_v30, %v3222_v38  ;;  %v3223_v57 = vmax.f32 %v3214_v39, 0.0  ;;  %3353 = vadd.xlane.f32.xlu1 %v3352_v40  ;;  %v3266_v58 = vadd.f32 1e-06, %v3258_v29  ;;  %v3284_v45 = vsub.f32 %v3236_v26, %v3276_v33 }
 0x2ff   :  { %3305 = vadd.xlane.f32.xlu0 %v3304_v48  ;;  %v3347_v35 = vmul.f32 %v3291_v50, %v3291_v50  ;;  %v3267_v56 = vadd.f32 1e-06, %v3259_v25  ;;  %v3285_v15 = vsub.f32 %v3237_v36, %v3277_v43  ;;  %v3260_v0 = vsub.f32 %v3236_v26, %v3252_v46 }
 0x300   :  { %3246 = vst [vmem:[#allocation15 + $0x30] sm:$0xff] %v3238_v55  ;;  %v3239_v51 = vadd.f32 %v3231_v47, %v3223_v57  ;;  %v3298_v2 = vmul.f32 %v3266_v58, %v3266_v58  ;;  %v3292_v3 = vadd.f32 1e-06, %v3284_v45  ;;  %v3261_v4 = vsub.f32 %v3237_v36, %v3253_v53 }
 0x301   :  { %v3355_v6 = vadd.f32 %v3347_v35, %v3346_v52  ;;  %v3299_v8 = vmul.f32 %v3267_v56, %v3267_v56  ;;  %v3293_v7 = vadd.f32 1e-06, %v3285_v15  ;;  %v3268_v9 = vadd.f32 1e-06, %v3260_v0 }
 0x302   :  { %3247 = vst [vmem:[#allocation15 + $0x38] sm:$0xff] %v3239_v51  ;;  %v3348_v61 = vmul.f32 %v3292_v3, %v3292_v3  ;;  %v3269_v11 = vadd.f32 1e-06, %v3261_v4  ;;  %v3286_v12 = vsub.f32 %v3238_v55, %v3278_v59  ;;  %v3287_v42 = vsub.f32 %v3239_v51, %v3279_v1 }
 0x303   :  { %3356 = vadd.xlane.f32.xlu1 %v3355_v6  ;;  %v3307_v63 = vadd.f32 %v3299_v8, %v3298_v2  ;;  %v3349_v13 = vmul.f32 %v3293_v7, %v3293_v7  ;;  %v3300_v14 = vmul.f32 %v3268_v9, %v3268_v9  ;;  %v3262_v49 = vsub.f32 %v3238_v55, %v3254_v5 }
 0x304   :  { %v3301_v16 = vmul.f32 %v3269_v11, %v3269_v11  ;;  %v3294_v60 = vadd.f32 1e-06, %v3286_v12  ;;  %v3295_v17 = vadd.f32 1e-06, %v3287_v42  ;;  %v3263_v62 = vsub.f32 %v3239_v51, %v3255_v10 }
 0x305   :  { %3308 = vadd.xlane.f32.xlu0 %v3307_v63  ;;  %v3358_v34 = vadd.f32 %v3349_v13, %v3348_v61  ;;  %v3270_v18 = vadd.f32 1e-06, %v3262_v49 }
 0x306   :  { %v3310_v19 = vadd.f32 %v3301_v16, %v3300_v14  ;;  %v3350_v20 = vmul.f32 %v3294_v60, %v3294_v60  ;;  %v3351_v22 = vmul.f32 %v3295_v17, %v3295_v17  ;;  %v3271_v21 = vadd.f32 1e-06, %v3263_v62 }
 0x307   :  { %3359 = vadd.xlane.f32.xlu1 %v3358_v34  ;;  %v3302_v24 = vmul.f32 %v3270_v18, %v3270_v18 }
 0x308   :  { %v3361_v23 = vadd.f32 %v3351_v22, %v3350_v20  ;;  %v3303_v26 = vmul.f32 %v3271_v21, %v3271_v21 }
 0x309   :  { %3311 = vadd.xlane.f32.xlu0 %v3310_v19 }
 0x30a   :  { %v3313_v27 = vadd.f32 %v3303_v26, %v3302_v24 }
 0x30b   :  { %3362 = vadd.xlane.f32.xlu1 %v3361_v23 }
 0x30d   :  { %3314 = vadd.xlane.f32.xlu0 %v3313_v27 }
 0x387   :  { %v3354_v28 = vpop.xlane.xlu1 %3353 }
 0x388   :  { %4070 = vrsqrt.f32 %v3354_v28  ;;  %v3306_v54 = vpop.xlane.xlu0 %3305  ;;  %vm3366_vm0 = vcmp.eq.f32.partialorder %v3354_v28, inf  ;;  %v3369_v46 = vand.u32 2147483648, %v3354_v28  ;;  %vm3368_vm2 = vcmp.eq.f32.partialorder %v3354_v28, 0.0 }
 0x389   :  { %4072 = vrsqrt.f32 %v3306_v54  ;;  %vm3318_vm1 = vcmp.eq.f32.partialorder %v3306_v54, inf  ;;  %v3321_v47 = vand.u32 2147483648, %v3306_v54  ;;  %vm3320_vm3 = vcmp.eq.f32.partialorder %v3306_v54, 0.0 }
 0x38c   :  { %v3357_v44 = vpop.xlane.xlu1 %3356 }
 0x38d   :  { %4074 = vrsqrt.f32 %v3357_v44  ;;  %vm3373_vm4 = vcmp.eq.f32.partialorder %v3357_v44, inf  ;;  %v3376_v52 = vand.u32 2147483648, %v3357_v44  ;;  %vm3375_vm5 = vcmp.eq.f32.partialorder %v3357_v44, 0.0 }
 0x38e   :  { %v3309_v30 = vpop.xlane.xlu0 %3308 }
 0x38f   :  { %4076 = vrsqrt.f32 %v3309_v30  ;;  %vm3325_vm6 = vcmp.eq.f32.partialorder %v3309_v30, inf  ;;  %v3328_v45 = vand.u32 2147483648, %v3309_v30  ;;  %vm3327_vm7 = vcmp.eq.f32.partialorder %v3309_v30, 0.0 }
 0x390   :  { %v3360_v37 = vpop.xlane.xlu1 %3359 }
 0x391   :  { %4078 = vrsqrt.f32 %v3360_v37  ;;  %vm3380_vm8 = vcmp.eq.f32.partialorder %v3360_v37, inf  ;;  %v3383_v1 = vand.u32 2147483648, %v3360_v37  ;;  %vm3382_vm9 = vcmp.eq.f32.partialorder %v3360_v37, 0.0 }
 0x392   :  { %v3312_v41 = vpop.xlane.xlu0 %3311 }
 0x393   :  { %4080 = vrsqrt.f32 %v3312_v41  ;;  %vm3332_vm10 = vcmp.eq.f32.partialorder %v3312_v41, inf  ;;  %v3335_v6 = vand.u32 2147483648, %v3312_v41  ;;  %vm3334_vm11 = vcmp.eq.f32.partialorder %v3312_v41, 0.0 }
 0x394   :  { %v4491_v31 = vpop.xlane.xlu1 %3362 }
 0x395   :  { %v4071_v32 = vpop.eup %4070  ;;  %4082 = vrsqrt.f32 %v4491_v31  ;;  %vm3387_vm12 = vcmp.eq.f32.partialorder %v4491_v31, inf  ;;  %vm3389_vm13 = vcmp.eq.f32.partialorder %v4491_v31, 0.0  ;;  %v3390_v12 = vand.u32 2147483648, %v4491_v31 }
 0x396   :  { %v4073_v29 = vpop.eup %4072  ;;  %v3365_v33 = vmul.f32 %v4071_v32, %v3354_v28  ;;  %v4494_v36 = vpop.xlane.xlu0 %3314 }
 0x397   :  { %v3317_v38 = vmul.f32 %v4073_v29, %v3306_v54  ;;  %4084 = vrsqrt.f32 %v4494_v36  ;;  %vm3339_vm14 = vcmp.eq.f32.partialorder %v4494_v36, inf  ;;  %v3342_v16 = vand.u32 2147483648, %v4494_v36 }
 0x398   :  { %v3367_v39 = vsel %vm3366_vm0, %v3354_v28, %v3365_v33  ;;  %vm3341_vm15 = vcmp.eq.f32.partialorder %v4494_v36, 0.0  ;;  %vm3404_vm0 = vcmask 7168  }
 0x399   :  { %v3319_v40 = vsel %vm3318_vm1, %v3306_v54, %v3317_v38  ;;  %v3370_v53 = vsel %vm3368_vm2, %v3369_v46, %v3367_v39 }
 0x39a   :  { %v4075_v43 = vpop.eup %4074  ;;  %v3322_v25 = vsel %vm3320_vm3, %v3321_v47, %v3319_v40 }
 0x39b   :  { %v3372_v48 = vmul.f32 %v4075_v43, %v3357_v44  ;;  %v3392_v0 = vsub.f32 %v3322_v25, %v3370_v53 }
 0x39c   :  { %v4077_v50 = vpop.eup %4076 }
 0x39d   :  { %v3374_v55 = vsel %vm3373_vm4, %v3357_v44, %v3372_v48  ;;  %v3324_v57 = vmul.f32 %v4077_v50, %v3309_v30  ;;  %v3396_v10 = vadd.f32 0.5, %v3392_v0 }
 0x39e   :  { %v4079_v58 = vpop.eup %4078  ;;  %v3377_v35 = vsel %vm3375_vm5, %v3376_v52, %v3374_v55 }
 0x39f   :  { %v3326_v56 = vsel %vm3325_vm6, %v3309_v30, %v3324_v57  ;;  %v3379_v15 = vmul.f32 %v4079_v58, %v3360_v37  ;;  %v3400_v34 = vmax.f32 %v3396_v10, 0.0 }
 0x3a0   :  { %v4081_v59 = vpop.eup %4080  ;;  %v3329_v51 = vsel %vm3327_vm7, %v3328_v45, %v3326_v56 }
 0x3a1   :  { %v3331_v2 = vmul.f32 %v4081_v59, %v3312_v41  ;;  %v3381_v3 = vsel %vm3380_vm8, %v3360_v37, %v3379_v15  ;;  %v3393_v4 = vsub.f32 %v3329_v51, %v3377_v35  ;;  %v3405_v23 = vsel %vm3404_vm0, %v3400_v34, 0.0 }
 0x3a2   :  { %v4083_v5 = vpop.eup %4082  ;;  %v3384_v8 = vsel %vm3382_vm9, %v3383_v1, %v3381_v3 }
 0x3a3   :  { %v3386_v7 = vmul.f32 %v4083_v5, %v4491_v31  ;;  %v3333_v9 = vsel %vm3332_vm10, %v3312_v41, %v3331_v2  ;;  %v3397_v61 = vadd.f32 0.5, %v3393_v4 }
 0x3a4   :  { %v4085_v11 = vpop.eup %4084  ;;  %v3336_v42 = vsel %vm3334_vm11, %v3335_v6, %v3333_v9 }
 0x3a5   :  { %v3388_v63 = vsel %vm3387_vm12, %v4491_v31, %v3386_v7  ;;  %v3338_v13 = vmul.f32 %v4085_v11, %v4494_v36  ;;  %v3394_v14 = vsub.f32 %v3336_v42, %v3384_v8  ;;  %v3401_v49 = vmax.f32 %v3397_v61, 0.0 }
 0x3a6   :  { %v3391_v60 = vsel %vm3389_vm13, %v3390_v12, %v3388_v63 }
 0x3a7   :  { %v3340_v17 = vsel %vm3339_vm14, %v4494_v36, %v3338_v13  ;;  %v3398_v62 = vadd.f32 0.5, %v3394_v14  ;;  %v3406_v22 = vsel %vm3404_vm0, %v3401_v49, 0.0 }
 0x3a8   :  { %v3343_v18 = vsel %vm3341_vm15, %v3342_v16, %v3340_v17  ;;  %v3407_v26 = vadd.f32 %v3406_v22, %v3405_v23 }
 0x3a9   :  { %v3395_v19 = vsub.f32 %v3343_v18, %v3391_v60  ;;  %v3402_v20 = vmax.f32 %v3398_v62, 0.0 }
 0x3ab   :  { %v3399_v21 = vadd.f32 0.5, %v3395_v19  ;;  %v3408_v24 = vsel %vm3404_vm0, %v3402_v20, 0.0 }
 0x3ac   :  { %v3409_v28 = vadd.f32 %v3408_v24, %v3407_v26 }
 0x3ad   :  { %v3403_v27 = vmax.f32 %v3399_v21, 0.0 }
 0x3af   :  { %v3410_v54 = vsel %vm3404_vm0, %v3403_v27, 0.0 }
 0x3b0   :  { %v3411_v44 = vadd.f32 %v3410_v54, %v3409_v28 }
 0x3b2   :  { %3412 = vadd.xlane.f32.xlu0 %v3411_v44 }
 0x3b3   :  { %4245 = shalt.err (!%p4242_p11)
}
 0x3b4   :  { %3435 = dma.vmem_to_hbm [thread:$0]  %s3430_s24, 1024, %s4524_s8, [#allocation4], %s4282_s27, %s4282_s27, %s4283_s28  }
 0x3b5   :  { %s4288_s30 = smov [#allocation16]  }
 0x43b   :  { %v3413_v30 = vpop.xlane.xlu0 %3412 }
 0x43c   :  { %v3414_v37 = vrot.slane %v3413_v30, 4 }
 0x43e   :  { %v3415_v41 = vadd.f32 %v3414_v37, %v3413_v30 }
 0x440   :  { %v3416_v31 = vrot.slane %v3415_v41, 2 }
 0x442   :  { %v3417_v32 = vadd.f32 %v3416_v31, %v3415_v41 }
 0x444   :  { %v3418_v29 = vrot.slane %v3417_v32, 1 }
 0x446   :  { %v3419_v33 = vadd.f32 %v3418_v29, %v3417_v32 }
 0x448   :  { %3849 = vpush %v3419_v33 }
 0x479   :  { %s3850_s29 = spop %3849 }
 0x47a   :  { %s3421_s3 = smul.f32 0.03125, %s3850_s29 }
 0x47c   :  { %3423 = sst [smem:[#allocation16]] %s3421_s3 }
 0x47d   :  { %3443 = dma.smem_to_hbm %s4288_s30, 16, %s4525_s9, [#allocation5]  }
 0x47e   :  { %4270 = dma.done.wait [#allocation4], 1024  }
 0x47f   :  { %4271 = vsyncadd [#allocation4], 4294966272 }
 0x480   :  { %4272 = dma.done.wait [#allocation5], 16  }
 0x481   :  { %4273 = vsyncadd [#allocation5], 4294967280 }
 0x482   :  { %3450 = sfence }
 0x483   :  { %3451 = vsyncpa [#allocation3], 1 }
 0x484   :  { %3452 = vsyncpa [#allocation7], 1 }
 0x485   :  { %3453 = vsyncpa [#allocation10], 1 }
 0x486   :  { %3454 = vsyncpa [#allocation13], 1 }
 0x487   :  { %3455 = vsyncpa [#allocation4], 1 }
 0x488   :  { %3456 = vsyncpa [#allocation5], 1 }

</bundles_post_ra>
